<compile_context>
chip_gen: v7x
topology: tpu7x:2x2x1
jax: 0.10.0
libtpu: 0.0.40
codegen_flags: <defaults>
</compile_context>

<pallas_src>
import functools

import jax
import jax.numpy as jnp
from jax import lax
from jax.experimental import pallas as pl
from jax.experimental.pallas import tpu as pltpu


# ---------------------------------------------------------------------------
# Fused kernel: QKV projection + policy-masked attention + output projection
# for one batch element (all heads) per grid step.
# ---------------------------------------------------------------------------
def _fused_policy_attention_kernel(pol_ref, x_ref, wqkv_ref, wproj_ref, b_ref,
                                   o_ref, qkv_scr, attn_scr, *,
                                   scale, eps, num_heads, head_dim):
    # Ref shapes (squeezed):
    #   pol_ref  (1, N) f32        x_ref    (N, C) bf16
    #   wqkv_ref (C, 3C) bf16      wproj_ref (C, C) bf16    b_ref (1, C) f32
    #   o_ref    (N, C) f32
    #   qkv_scr  (N, 3C) bf16      attn_scr (N, C) f32
    N, C = x_ref.shape
    D = head_dim
    H = num_heads

    # ---- QKV projection for this batch element (lane-dense, full K) ----
    qkv_scr[...] = jnp.dot(x_ref[...], wqkv_ref[...],
                           preferred_element_type=jnp.float32
                           ).astype(qkv_scr.dtype)            # (N, 3C)

    # ---- policy mask, shared across all heads ----
    # attn_policy[i, j] = 1 on the diagonal, policy[j] elsewhere.
    pol = pol_ref[...]                                        # (1, N) f32
    row = lax.broadcasted_iota(jnp.int32, (N, N), 0)
    col = lax.broadcasted_iota(jnp.int32, (N, N), 1)
    attn_policy = jnp.where(row == col, 1.0, pol)             # (N, N) f32
    eps_over_n = eps / N

    # ---- per-head attention (static lane slices of the resident scratch) ----
    for h in range(H):
        q = qkv_scr[:, h * D:(h + 1) * D]                     # (N, D) bf16
        k = qkv_scr[:, C + h * D:C + (h + 1) * D]             # (N, D) bf16
        v = qkv_scr[:, 2 * C + h * D:2 * C + (h + 1) * D]     # (N, D) bf16

        # s = (q @ k^T) * scale, scores scaled in f32 for fidelity.
        s = lax.dot_general(q, k,
                            dimension_numbers=(((1,), (1,)), ((), ())),
                            preferred_element_type=jnp.float32) * scale

        # softmax_with_policy (f32 statistics, EUP reciprocal).
        m = jnp.max(s, axis=-1, keepdims=True)
        e = jnp.exp(s - m) * attn_policy
        denom = jnp.sum(e, axis=-1, keepdims=True) + eps
        attn = (e + eps_over_n) * pl.reciprocal(denom, approx=True)

        out_h = jnp.dot(attn.astype(v.dtype), v,
                        preferred_element_type=jnp.float32)   # (N, D) f32
        attn_scr[:, h * D:(h + 1) * D] = out_h

    # ---- output projection + bias; one lane-dense (N, C) HBM store ----
    y = jnp.dot(attn_scr[...].astype(wproj_ref.dtype), wproj_ref[...],
                preferred_element_type=jnp.float32) + b_ref[...]
    o_ref[...] = y.astype(o_ref.dtype)


def policy_attention_forward(x, policy, w_qkv, w_proj, b_proj, num_heads,
                             eps=1e-6):
    """x: (B, N, C) f32; policy: (B, N, 1); w_qkv: (C, 3C); w_proj: (C, C);
    b_proj: (1, C). Returns (B, N, C) f32."""
    B, N, C = x.shape
    D = C // num_heads
    scale = D ** -0.5

    xb = x.astype(jnp.bfloat16)
    pol = policy.reshape(B, 1, N).astype(jnp.float32)   # pure reshape
    # .astype is a no-op if the caller pre-casts the weights once (preferred).
    wqkv = w_qkv.astype(jnp.bfloat16)
    wproj = w_proj.astype(jnp.bfloat16)
    bproj = b_proj.reshape(1, C).astype(jnp.float32)

    kern = functools.partial(_fused_policy_attention_kernel,
                             scale=scale, eps=eps,
                             num_heads=num_heads, head_dim=D)

    return pl.pallas_call(
        kern,
        out_shape=jax.ShapeDtypeStruct((B, N, C), jnp.float32),
        grid=(B,),
        in_specs=[
            pl.BlockSpec((None, 1, N), lambda b: (b, 0, 0)),   # policy
            pl.BlockSpec((None, N, C), lambda b: (b, 0, 0)),   # x
            pl.BlockSpec((C, 3 * C), lambda b: (0, 0)),        # W_qkv (resident)
            pl.BlockSpec((C, C), lambda b: (0, 0)),            # W_proj (resident)
            pl.BlockSpec((1, C), lambda b: (0, 0)),            # bias   (resident)
        ],
        out_specs=pl.BlockSpec((None, N, C), lambda b: (b, 0, 0)),
        scratch_shapes=[
            pltpu.VMEM((N, 3 * C), jnp.bfloat16),              # qkv of one batch elem
            pltpu.VMEM((N, C), jnp.float32),                   # attention output
        ],
        compiler_params=pltpu.CompilerParams(
            dimension_semantics=("parallel",),
            vmem_limit_bytes=32 * 1024 * 1024),
    )(pol, xb, wqkv, wproj, bproj)


# ---------------------------------------------------------------------------
# Pure-JAX f32 reference (module semantics) for correctness check.
# ---------------------------------------------------------------------------
def reference_forward(x, policy, w_qkv, w_proj, b_proj, num_heads, eps=1e-6):
    B, N, C = x.shape
    D = C // num_heads
    scale = D ** -0.5
    qkv = (x.reshape(B * N, C) @ w_qkv).reshape(B, N, 3, num_heads, D)
    qkv = qkv.transpose(2, 0, 3, 1, 4)
    q, k, v = qkv[0], qkv[1], qkv[2]
    attn = jnp.einsum("bhnd,bhmd->bhnm", q, k) * scale
    attn_policy = policy.reshape(B, 1, 1, N)
    eye = jnp.eye(N, dtype=attn_policy.dtype).reshape(1, 1, N, N)
    attn_policy = attn_policy + (1.0 - attn_policy) * eye
    max_att = jnp.max(attn, axis=-1, keepdims=True)
    e = jnp.exp(attn - max_att) * attn_policy
    attn = (e + eps / N) / (jnp.sum(e, axis=-1, keepdims=True) + eps)
    o = jnp.einsum("bhnm,bhmd->bhnd", attn, v)
    o = o.transpose(0, 2, 1, 3).reshape(B * N, C)
    return (o @ w_proj + b_proj).reshape(B, N, C)


if __name__ == "__main__":
    B, N, C, H = 2, 16, 32, 8   # head_dim = 4

    key = jax.random.PRNGKey(0)
    k1, k2, k3, k4, k5 = jax.random.split(key, 5)

    x = jax.random.normal(k1, (B, N, C), dtype=jnp.float32)
    # binary keep/drop policy, shape (B, N, 1) as in DyViT
    policy = (jax.random.uniform(k2, (B, N, 1)) > 0.3).astype(jnp.float32)

    # deterministic synthetic parameters (qkv_bias=False as in module default)
    w_qkv = jax.random.normal(k3, (C, 3 * C), dtype=jnp.float32) * 0.05
    w_proj = jax.random.normal(k4, (C, C), dtype=jnp.float32) * 0.05
    b_proj = jax.random.normal(k5, (1, C), dtype=jnp.float32) * 0.05

    # Pre-cast weights once (hoists the bf16 casts out of the per-step jit).
    w_qkv_bf16 = w_qkv.astype(jnp.bfloat16)
    w_proj_bf16 = w_proj.astype(jnp.bfloat16)

    fwd = jax.jit(policy_attention_forward, static_argnums=(5,))
    out = fwd(x, policy, w_qkv_bf16, w_proj_bf16, b_proj, H)
    out = jax.block_until_ready(out)

    ref = reference_forward(x, policy, w_qkv, w_proj, b_proj, H)
    assert out.shape == (B, N, C)
    # bf16 MXU operands + approx reciprocal -> modest tolerance vs f32 ref.
    assert jnp.allclose(out, ref, atol=1e-2, rtol=5e-2), "mismatch vs reference"

    print("KERNEL_OK")
</pallas_src>

<mosaic_0001>
module attributes {stable_mosaic.version = 11 : i64} {
  func.func @_fused_policy_attention_kernel(%arg0: i32, %arg1: memref<1x1x16xf32, #tpu.memory_space<vmem>>, %arg2: memref<1x16x32xbf16, #tpu.memory_space<vmem>>, %arg3: memref<32x96xbf16, #tpu.memory_space<vmem>>, %arg4: memref<32x32xbf16, #tpu.memory_space<vmem>>, %arg5: memref<1x32xf32, #tpu.memory_space<vmem>>, %arg6: memref<1x16x32xf32, #tpu.memory_space<vmem>>, %arg7: memref<16x96xbf16, #tpu.memory_space<vmem>>, %arg8: memref<16x32xf32, #tpu.memory_space<vmem>>) attributes {dimension_semantics = [#tpu.dimension_semantics<parallel>], iteration_bounds = array<i64: 2>, scalar_prefetch = 0 : i64, scratch_operands = 2 : i64, tpu.core_type = #tpu.core_type<tc>, window_params = [{transform_indices = @transform_0, window_bounds = array<i64: 1, 1, 16>}, {transform_indices = @transform_1, window_bounds = array<i64: 1, 16, 32>}, {pipeline_mode = #tpu.pipeline_mode<synchronous>, transform_indices = @transform_2, window_bounds = array<i64: 32, 96>}, {pipeline_mode = #tpu.pipeline_mode<synchronous>, transform_indices = @transform_3, window_bounds = array<i64: 32, 32>}, {pipeline_mode = #tpu.pipeline_mode<synchronous>, transform_indices = @transform_4, window_bounds = array<i64: 1, 32>}, {transform_indices = @transform_5, window_bounds = array<i64: 1, 16, 32>}]} {
    %c0 = arith.constant 0 : index
    %c0_0 = arith.constant 0 : index
    %c0_1 = arith.constant 0 : index
    %0 = vector.load %arg2[%c0, %c0_0, %c0_1] : memref<1x16x32xbf16, #tpu.memory_space<vmem>>, vector<1x16x32xbf16>
    %1 = vector.shape_cast %0 : vector<1x16x32xbf16> to vector<16x32xbf16>
    %c0_2 = arith.constant 0 : index
    %c0_3 = arith.constant 0 : index
    %2 = vector.load %arg3[%c0_2, %c0_3] : memref<32x96xbf16, #tpu.memory_space<vmem>>, vector<32x96xbf16>
    %cst = arith.constant dense<0.000000e+00> : vector<16x96xf32>
    %3 = tpu.matmul %1, %2, %cst {dimension_numbers = #tpu.dot_dimension_numbers<[1], [0], [0], [1], [0, 0, 1, 1], [], []>} : vector<16x32xbf16>, vector<32x96xbf16>, vector<16x96xf32> -> vector<16x96xf32>
    %4 = arith.truncf %3 : vector<16x96xf32> to vector<16x96xbf16>
    %c0_4 = arith.constant 0 : index
    %c0_5 = arith.constant 0 : index
    %5 = vector.load %arg7[%c0_4, %c0_5] : memref<16x96xbf16, #tpu.memory_space<vmem>>, vector<16x96xbf16>
    tpu.vector_store %arg7[%c0_4, %c0_5], %4 {strides = array<i32>} : memref<16x96xbf16, #tpu.memory_space<vmem>>, vector<16x96xbf16>,
    %c0_6 = arith.constant 0 : index
    %c0_7 = arith.constant 0 : index
    %c0_8 = arith.constant 0 : index
    %6 = vector.load %arg1[%c0_6, %c0_7, %c0_8] : memref<1x1x16xf32, #tpu.memory_space<vmem>>, vector<1x1x16xf32>
    %7 = vector.shape_cast %6 : vector<1x1x16xf32> to vector<1x16xf32>
    %8 = tpu.iota {dimensions = array<i32: 0>} : vector<16x16xi32>
    %9 = tpu.iota {dimensions = array<i32: 1>} : vector<16x16xi32>
    %10 = arith.cmpi eq, %8, %9 : vector<16x16xi32>
    %cst_9 = arith.constant 1.000000e+00 : f32
    %11 = vector.broadcast %cst_9 : f32 to vector<16x16xf32>
    %12 = vector.shape_cast %7 : vector<1x16xf32> to vector<1x16xf32>
    %13 = vector.broadcast %12 : vector<1x16xf32> to vector<16x16xf32>
    %14 = arith.select %10, %11, %13 : vector<16x16xi1>, vector<16x16xf32>
    %c0_10 = arith.constant 0 : index
    %c0_11 = arith.constant 0 : index
    %15 = vector.load %arg7[%c0_10, %c0_11] : memref<16x96xbf16, #tpu.memory_space<vmem>>, vector<16x4xbf16>
    %c0_12 = arith.constant 0 : index
    %c32 = arith.constant 32 : index
    %16 = vector.load %arg7[%c0_12, %c32] : memref<16x96xbf16, #tpu.memory_space<vmem>>, vector<16x4xbf16>
    %c0_13 = arith.constant 0 : index
    %c64 = arith.constant 64 : index
    %17 = vector.load %arg7[%c0_13, %c64] : memref<16x96xbf16, #tpu.memory_space<vmem>>, vector<16x4xbf16>
    %cst_14 = arith.constant dense<0.000000e+00> : vector<16x16xf32>
    %18 = tpu.matmul %15, %16, %cst_14 {dimension_numbers = #tpu.dot_dimension_numbers<[1], [1], [0], [0], [0, 0, 1, 0], [], []>} : vector<16x4xbf16>, vector<16x4xbf16>, vector<16x16xf32> -> vector<16x16xf32>
    %cst_15 = arith.constant 5.000000e-01 : f32
    %19 = vector.broadcast %cst_15 : f32 to vector<16x16xf32>
    %20 = arith.mulf %18, %19 : vector<16x16xf32>
    %cst_16 = arith.constant dense<0xFF800000> : vector<16xf32>
    %21 = vector.multi_reduction <maximumf>, %20, %cst_16 [1] : vector<16x16xf32> to vector<16xf32>
    %22 = vector.shape_cast %21 : vector<16xf32> to vector<16x1xf32>
    %23 = vector.broadcast %22 : vector<16x1xf32> to vector<16x16xf32>
    %24 = arith.subf %20, %23 : vector<16x16xf32>
    %25 = math.exp %24 : vector<16x16xf32>
    %26 = arith.mulf %25, %14 : vector<16x16xf32>
    %cst_17 = arith.constant dense<0.000000e+00> : vector<16xf32>
    %27 = vector.multi_reduction <add>, %26, %cst_17 [1] : vector<16x16xf32> to vector<16xf32>
    %28 = vector.shape_cast %27 : vector<16xf32> to vector<16x1xf32>
    %cst_18 = arith.constant 9.99999997E-7 : f32
    %29 = vector.broadcast %cst_18 : f32 to vector<16x1xf32>
    %30 = arith.addf %28, %29 : vector<16x1xf32>
    %cst_19 = arith.constant 6.24999998E-8 : f32
    %31 = vector.broadcast %cst_19 : f32 to vector<16x16xf32>
    %32 = arith.addf %26, %31 : vector<16x16xf32>
    %33 = tpu.reciprocal %30 {approx = true} : vector<16x1xf32> -> vector<16x1xf32>
    %34 = vector.broadcast %33 : vector<16x1xf32> to vector<16x16xf32>
    %35 = arith.mulf %32, %34 : vector<16x16xf32>
    %36 = arith.truncf %35 : vector<16x16xf32> to vector<16x16xbf16>
    %cst_20 = arith.constant dense<0.000000e+00> : vector<16x4xf32>
    %37 = tpu.matmul %36, %17, %cst_20 {dimension_numbers = #tpu.dot_dimension_numbers<[1], [0], [0], [1], [0, 0, 1, 1], [], []>} : vector<16x16xbf16>, vector<16x4xbf16>, vector<16x4xf32> -> vector<16x4xf32>
    %c0_21 = arith.constant 0 : index
    %c0_22 = arith.constant 0 : index
    %38 = vector.load %arg8[%c0_21, %c0_22] : memref<16x32xf32, #tpu.memory_space<vmem>>, vector<16x4xf32>
    tpu.vector_store %arg8[%c0_21, %c0_22], %37 {strides = array<i32>} : memref<16x32xf32, #tpu.memory_space<vmem>>, vector<16x4xf32>,
    %c0_23 = arith.constant 0 : index
    %c4 = arith.constant 4 : index
    %39 = vector.load %arg7[%c0_23, %c4] : memref<16x96xbf16, #tpu.memory_space<vmem>>, vector<16x4xbf16>
    %c0_24 = arith.constant 0 : index
    %c36 = arith.constant 36 : index
    %40 = vector.load %arg7[%c0_24, %c36] : memref<16x96xbf16, #tpu.memory_space<vmem>>, vector<16x4xbf16>
    %c0_25 = arith.constant 0 : index
    %c68 = arith.constant 68 : index
    %41 = vector.load %arg7[%c0_25, %c68] : memref<16x96xbf16, #tpu.memory_space<vmem>>, vector<16x4xbf16>
    %cst_26 = arith.constant dense<0.000000e+00> : vector<16x16xf32>
    %42 = tpu.matmul %39, %40, %cst_26 {dimension_numbers = #tpu.dot_dimension_numbers<[1], [1], [0], [0], [0, 0, 1, 0], [], []>} : vector<16x4xbf16>, vector<16x4xbf16>, vector<16x16xf32> -> vector<16x16xf32>
    %cst_27 = arith.constant 5.000000e-01 : f32
    %43 = vector.broadcast %cst_27 : f32 to vector<16x16xf32>
    %44 = arith.mulf %42, %43 : vector<16x16xf32>
    %cst_28 = arith.constant dense<0xFF800000> : vector<16xf32>
    %45 = vector.multi_reduction <maximumf>, %44, %cst_28 [1] : vector<16x16xf32> to vector<16xf32>
    %46 = vector.shape_cast %45 : vector<16xf32> to vector<16x1xf32>
    %47 = vector.broadcast %46 : vector<16x1xf32> to vector<16x16xf32>
    %48 = arith.subf %44, %47 : vector<16x16xf32>
    %49 = math.exp %48 : vector<16x16xf32>
    %50 = arith.mulf %49, %14 : vector<16x16xf32>
    %cst_29 = arith.constant dense<0.000000e+00> : vector<16xf32>
    %51 = vector.multi_reduction <add>, %50, %cst_29 [1] : vector<16x16xf32> to vector<16xf32>
    %52 = vector.shape_cast %51 : vector<16xf32> to vector<16x1xf32>
    %cst_30 = arith.constant 9.99999997E-7 : f32
    %53 = vector.broadcast %cst_30 : f32 to vector<16x1xf32>
    %54 = arith.addf %52, %53 : vector<16x1xf32>
    %cst_31 = arith.constant 6.24999998E-8 : f32
    %55 = vector.broadcast %cst_31 : f32 to vector<16x16xf32>
    %56 = arith.addf %50, %55 : vector<16x16xf32>
    %57 = tpu.reciprocal %54 {approx = true} : vector<16x1xf32> -> vector<16x1xf32>
    %58 = vector.broadcast %57 : vector<16x1xf32> to vector<16x16xf32>
    %59 = arith.mulf %56, %58 : vector<16x16xf32>
    %60 = arith.truncf %59 : vector<16x16xf32> to vector<16x16xbf16>
    %cst_32 = arith.constant dense<0.000000e+00> : vector<16x4xf32>
    %61 = tpu.matmul %60, %41, %cst_32 {dimension_numbers = #tpu.dot_dimension_numbers<[1], [0], [0], [1], [0, 0, 1, 1], [], []>} : vector<16x16xbf16>, vector<16x4xbf16>, vector<16x4xf32> -> vector<16x4xf32>
    %c0_33 = arith.constant 0 : index
    %c4_34 = arith.constant 4 : index
    %62 = vector.load %arg8[%c0_33, %c4_34] : memref<16x32xf32, #tpu.memory_space<vmem>>, vector<16x4xf32>
    tpu.vector_store %arg8[%c0_33, %c4_34], %61 {strides = array<i32>} : memref<16x32xf32, #tpu.memory_space<vmem>>, vector<16x4xf32>,
    %c0_35 = arith.constant 0 : index
    %c8 = arith.constant 8 : index
    %63 = vector.load %arg7[%c0_35, %c8] : memref<16x96xbf16, #tpu.memory_space<vmem>>, vector<16x4xbf16>
    %c0_36 = arith.constant 0 : index
    %c40 = arith.constant 40 : index
    %64 = vector.load %arg7[%c0_36, %c40] : memref<16x96xbf16, #tpu.memory_space<vmem>>, vector<16x4xbf16>
    %c0_37 = arith.constant 0 : index
    %c72 = arith.constant 72 : index
    %65 = vector.load %arg7[%c0_37, %c72] : memref<16x96xbf16, #tpu.memory_space<vmem>>, vector<16x4xbf16>
    %cst_38 = arith.constant dense<0.000000e+00> : vector<16x16xf32>
    %66 = tpu.matmul %63, %64, %cst_38 {dimension_numbers = #tpu.dot_dimension_numbers<[1], [1], [0], [0], [0, 0, 1, 0], [], []>} : vector<16x4xbf16>, vector<16x4xbf16>, vector<16x16xf32> -> vector<16x16xf32>
    %cst_39 = arith.constant 5.000000e-01 : f32
    %67 = vector.broadcast %cst_39 : f32 to vector<16x16xf32>
    %68 = arith.mulf %66, %67 : vector<16x16xf32>
    %cst_40 = arith.constant dense<0xFF800000> : vector<16xf32>
    %69 = vector.multi_reduction <maximumf>, %68, %cst_40 [1] : vector<16x16xf32> to vector<16xf32>
    %70 = vector.shape_cast %69 : vector<16xf32> to vector<16x1xf32>
    %71 = vector.broadcast %70 : vector<16x1xf32> to vector<16x16xf32>
    %72 = arith.subf %68, %71 : vector<16x16xf32>
    %73 = math.exp %72 : vector<16x16xf32>
    %74 = arith.mulf %73, %14 : vector<16x16xf32>
    %cst_41 = arith.constant dense<0.000000e+00> : vector<16xf32>
    %75 = vector.multi_reduction <add>, %74, %cst_41 [1] : vector<16x16xf32> to vector<16xf32>
    %76 = vector.shape_cast %75 : vector<16xf32> to vector<16x1xf32>
    %cst_42 = arith.constant 9.99999997E-7 : f32
    %77 = vector.broadcast %cst_42 : f32 to vector<16x1xf32>
    %78 = arith.addf %76, %77 : vector<16x1xf32>
    %cst_43 = arith.constant 6.24999998E-8 : f32
    %79 = vector.broadcast %cst_43 : f32 to vector<16x16xf32>
    %80 = arith.addf %74, %79 : vector<16x16xf32>
    %81 = tpu.reciprocal %78 {approx = true} : vector<16x1xf32> -> vector<16x1xf32>
    %82 = vector.broadcast %81 : vector<16x1xf32> to vector<16x16xf32>
    %83 = arith.mulf %80, %82 : vector<16x16xf32>
    %84 = arith.truncf %83 : vector<16x16xf32> to vector<16x16xbf16>
    %cst_44 = arith.constant dense<0.000000e+00> : vector<16x4xf32>
    %85 = tpu.matmul %84, %65, %cst_44 {dimension_numbers = #tpu.dot_dimension_numbers<[1], [0], [0], [1], [0, 0, 1, 1], [], []>} : vector<16x16xbf16>, vector<16x4xbf16>, vector<16x4xf32> -> vector<16x4xf32>
    %c0_45 = arith.constant 0 : index
    %c8_46 = arith.constant 8 : index
    %86 = vector.load %arg8[%c0_45, %c8_46] : memref<16x32xf32, #tpu.memory_space<vmem>>, vector<16x4xf32>
    tpu.vector_store %arg8[%c0_45, %c8_46], %85 {strides = array<i32>} : memref<16x32xf32, #tpu.memory_space<vmem>>, vector<16x4xf32>,
    %c0_47 = arith.constant 0 : index
    %c12 = arith.constant 12 : index
    %87 = vector.load %arg7[%c0_47, %c12] : memref<16x96xbf16, #tpu.memory_space<vmem>>, vector<16x4xbf16>
    %c0_48 = arith.constant 0 : index
    %c44 = arith.constant 44 : index
    %88 = vector.load %arg7[%c0_48, %c44] : memref<16x96xbf16, #tpu.memory_space<vmem>>, vector<16x4xbf16>
    %c0_49 = arith.constant 0 : index
    %c76 = arith.constant 76 : index
    %89 = vector.load %arg7[%c0_49, %c76] : memref<16x96xbf16, #tpu.memory_space<vmem>>, vector<16x4xbf16>
    %cst_50 = arith.constant dense<0.000000e+00> : vector<16x16xf32>
    %90 = tpu.matmul %87, %88, %cst_50 {dimension_numbers = #tpu.dot_dimension_numbers<[1], [1], [0], [0], [0, 0, 1, 0], [], []>} : vector<16x4xbf16>, vector<16x4xbf16>, vector<16x16xf32> -> vector<16x16xf32>
    %cst_51 = arith.constant 5.000000e-01 : f32
    %91 = vector.broadcast %cst_51 : f32 to vector<16x16xf32>
    %92 = arith.mulf %90, %91 : vector<16x16xf32>
    %cst_52 = arith.constant dense<0xFF800000> : vector<16xf32>
    %93 = vector.multi_reduction <maximumf>, %92, %cst_52 [1] : vector<16x16xf32> to vector<16xf32>
    %94 = vector.shape_cast %93 : vector<16xf32> to vector<16x1xf32>
    %95 = vector.broadcast %94 : vector<16x1xf32> to vector<16x16xf32>
    %96 = arith.subf %92, %95 : vector<16x16xf32>
    %97 = math.exp %96 : vector<16x16xf32>
    %98 = arith.mulf %97, %14 : vector<16x16xf32>
    %cst_53 = arith.constant dense<0.000000e+00> : vector<16xf32>
    %99 = vector.multi_reduction <add>, %98, %cst_53 [1] : vector<16x16xf32> to vector<16xf32>
    %100 = vector.shape_cast %99 : vector<16xf32> to vector<16x1xf32>
    %cst_54 = arith.constant 9.99999997E-7 : f32
    %101 = vector.broadcast %cst_54 : f32 to vector<16x1xf32>
    %102 = arith.addf %100, %101 : vector<16x1xf32>
    %cst_55 = arith.constant 6.24999998E-8 : f32
    %103 = vector.broadcast %cst_55 : f32 to vector<16x16xf32>
    %104 = arith.addf %98, %103 : vector<16x16xf32>
    %105 = tpu.reciprocal %102 {approx = true} : vector<16x1xf32> -> vector<16x1xf32>
    %106 = vector.broadcast %105 : vector<16x1xf32> to vector<16x16xf32>
    %107 = arith.mulf %104, %106 : vector<16x16xf32>
    %108 = arith.truncf %107 : vector<16x16xf32> to vector<16x16xbf16>
    %cst_56 = arith.constant dense<0.000000e+00> : vector<16x4xf32>
    %109 = tpu.matmul %108, %89, %cst_56 {dimension_numbers = #tpu.dot_dimension_numbers<[1], [0], [0], [1], [0, 0, 1, 1], [], []>} : vector<16x16xbf16>, vector<16x4xbf16>, vector<16x4xf32> -> vector<16x4xf32>
    %c0_57 = arith.constant 0 : index
    %c12_58 = arith.constant 12 : index
    %110 = vector.load %arg8[%c0_57, %c12_58] : memref<16x32xf32, #tpu.memory_space<vmem>>, vector<16x4xf32>
    tpu.vector_store %arg8[%c0_57, %c12_58], %109 {strides = array<i32>} : memref<16x32xf32, #tpu.memory_space<vmem>>, vector<16x4xf32>,
    %c0_59 = arith.constant 0 : index
    %c16 = arith.constant 16 : index
    %111 = vector.load %arg7[%c0_59, %c16] : memref<16x96xbf16, #tpu.memory_space<vmem>>, vector<16x4xbf16>
    %c0_60 = arith.constant 0 : index
    %c48 = arith.constant 48 : index
    %112 = vector.load %arg7[%c0_60, %c48] : memref<16x96xbf16, #tpu.memory_space<vmem>>, vector<16x4xbf16>
    %c0_61 = arith.constant 0 : index
    %c80 = arith.constant 80 : index
    %113 = vector.load %arg7[%c0_61, %c80] : memref<16x96xbf16, #tpu.memory_space<vmem>>, vector<16x4xbf16>
    %cst_62 = arith.constant dense<0.000000e+00> : vector<16x16xf32>
    %114 = tpu.matmul %111, %112, %cst_62 {dimension_numbers = #tpu.dot_dimension_numbers<[1], [1], [0], [0], [0, 0, 1, 0], [], []>} : vector<16x4xbf16>, vector<16x4xbf16>, vector<16x16xf32> -> vector<16x16xf32>
    %cst_63 = arith.constant 5.000000e-01 : f32
    %115 = vector.broadcast %cst_63 : f32 to vector<16x16xf32>
    %116 = arith.mulf %114, %115 : vector<16x16xf32>
    %cst_64 = arith.constant dense<0xFF800000> : vector<16xf32>
    %117 = vector.multi_reduction <maximumf>, %116, %cst_64 [1] : vector<16x16xf32> to vector<16xf32>
    %118 = vector.shape_cast %117 : vector<16xf32> to vector<16x1xf32>
    %119 = vector.broadcast %118 : vector<16x1xf32> to vector<16x16xf32>
    %120 = arith.subf %116, %119 : vector<16x16xf32>
    %121 = math.exp %120 : vector<16x16xf32>
    %122 = arith.mulf %121, %14 : vector<16x16xf32>
    %cst_65 = arith.constant dense<0.000000e+00> : vector<16xf32>
    %123 = vector.multi_reduction <add>, %122, %cst_65 [1] : vector<16x16xf32> to vector<16xf32>
    %124 = vector.shape_cast %123 : vector<16xf32> to vector<16x1xf32>
    %cst_66 = arith.constant 9.99999997E-7 : f32
    %125 = vector.broadcast %cst_66 : f32 to vector<16x1xf32>
    %126 = arith.addf %124, %125 : vector<16x1xf32>
    %cst_67 = arith.constant 6.24999998E-8 : f32
    %127 = vector.broadcast %cst_67 : f32 to vector<16x16xf32>
    %128 = arith.addf %122, %127 : vector<16x16xf32>
    %129 = tpu.reciprocal %126 {approx = true} : vector<16x1xf32> -> vector<16x1xf32>
    %130 = vector.broadcast %129 : vector<16x1xf32> to vector<16x16xf32>
    %131 = arith.mulf %128, %130 : vector<16x16xf32>
    %132 = arith.truncf %131 : vector<16x16xf32> to vector<16x16xbf16>
    %cst_68 = arith.constant dense<0.000000e+00> : vector<16x4xf32>
    %133 = tpu.matmul %132, %113, %cst_68 {dimension_numbers = #tpu.dot_dimension_numbers<[1], [0], [0], [1], [0, 0, 1, 1], [], []>} : vector<16x16xbf16>, vector<16x4xbf16>, vector<16x4xf32> -> vector<16x4xf32>
    %c0_69 = arith.constant 0 : index
    %c16_70 = arith.constant 16 : index
    %134 = vector.load %arg8[%c0_69, %c16_70] : memref<16x32xf32, #tpu.memory_space<vmem>>, vector<16x4xf32>
    tpu.vector_store %arg8[%c0_69, %c16_70], %133 {strides = array<i32>} : memref<16x32xf32, #tpu.memory_space<vmem>>, vector<16x4xf32>,
    %c0_71 = arith.constant 0 : index
    %c20 = arith.constant 20 : index
    %135 = vector.load %arg7[%c0_71, %c20] : memref<16x96xbf16, #tpu.memory_space<vmem>>, vector<16x4xbf16>
    %c0_72 = arith.constant 0 : index
    %c52 = arith.constant 52 : index
    %136 = vector.load %arg7[%c0_72, %c52] : memref<16x96xbf16, #tpu.memory_space<vmem>>, vector<16x4xbf16>
    %c0_73 = arith.constant 0 : index
    %c84 = arith.constant 84 : index
    %137 = vector.load %arg7[%c0_73, %c84] : memref<16x96xbf16, #tpu.memory_space<vmem>>, vector<16x4xbf16>
    %cst_74 = arith.constant dense<0.000000e+00> : vector<16x16xf32>
    %138 = tpu.matmul %135, %136, %cst_74 {dimension_numbers = #tpu.dot_dimension_numbers<[1], [1], [0], [0], [0, 0, 1, 0], [], []>} : vector<16x4xbf16>, vector<16x4xbf16>, vector<16x16xf32> -> vector<16x16xf32>
    %cst_75 = arith.constant 5.000000e-01 : f32
    %139 = vector.broadcast %cst_75 : f32 to vector<16x16xf32>
    %140 = arith.mulf %138, %139 : vector<16x16xf32>
    %cst_76 = arith.constant dense<0xFF800000> : vector<16xf32>
    %141 = vector.multi_reduction <maximumf>, %140, %cst_76 [1] : vector<16x16xf32> to vector<16xf32>
    %142 = vector.shape_cast %141 : vector<16xf32> to vector<16x1xf32>
    %143 = vector.broadcast %142 : vector<16x1xf32> to vector<16x16xf32>
    %144 = arith.subf %140, %143 : vector<16x16xf32>
    %145 = math.exp %144 : vector<16x16xf32>
    %146 = arith.mulf %145, %14 : vector<16x16xf32>
    %cst_77 = arith.constant dense<0.000000e+00> : vector<16xf32>
    %147 = vector.multi_reduction <add>, %146, %cst_77 [1] : vector<16x16xf32> to vector<16xf32>
    %148 = vector.shape_cast %147 : vector<16xf32> to vector<16x1xf32>
    %cst_78 = arith.constant 9.99999997E-7 : f32
    %149 = vector.broadcast %cst_78 : f32 to vector<16x1xf32>
    %150 = arith.addf %148, %149 : vector<16x1xf32>
    %cst_79 = arith.constant 6.24999998E-8 : f32
    %151 = vector.broadcast %cst_79 : f32 to vector<16x16xf32>
    %152 = arith.addf %146, %151 : vector<16x16xf32>
    %153 = tpu.reciprocal %150 {approx = true} : vector<16x1xf32> -> vector<16x1xf32>
    %154 = vector.broadcast %153 : vector<16x1xf32> to vector<16x16xf32>
    %155 = arith.mulf %152, %154 : vector<16x16xf32>
    %156 = arith.truncf %155 : vector<16x16xf32> to vector<16x16xbf16>
    %cst_80 = arith.constant dense<0.000000e+00> : vector<16x4xf32>
    %157 = tpu.matmul %156, %137, %cst_80 {dimension_numbers = #tpu.dot_dimension_numbers<[1], [0], [0], [1], [0, 0, 1, 1], [], []>} : vector<16x16xbf16>, vector<16x4xbf16>, vector<16x4xf32> -> vector<16x4xf32>
    %c0_81 = arith.constant 0 : index
    %c20_82 = arith.constant 20 : index
    %158 = vector.load %arg8[%c0_81, %c20_82] : memref<16x32xf32, #tpu.memory_space<vmem>>, vector<16x4xf32>
    tpu.vector_store %arg8[%c0_81, %c20_82], %157 {strides = array<i32>} : memref<16x32xf32, #tpu.memory_space<vmem>>, vector<16x4xf32>,
    %c0_83 = arith.constant 0 : index
    %c24 = arith.constant 24 : index
    %159 = vector.load %arg7[%c0_83, %c24] : memref<16x96xbf16, #tpu.memory_space<vmem>>, vector<16x4xbf16>
    %c0_84 = arith.constant 0 : index
    %c56 = arith.constant 56 : index
    %160 = vector.load %arg7[%c0_84, %c56] : memref<16x96xbf16, #tpu.memory_space<vmem>>, vector<16x4xbf16>
    %c0_85 = arith.constant 0 : index
    %c88 = arith.constant 88 : index
    %161 = vector.load %arg7[%c0_85, %c88] : memref<16x96xbf16, #tpu.memory_space<vmem>>, vector<16x4xbf16>
    %cst_86 = arith.constant dense<0.000000e+00> : vector<16x16xf32>
    %162 = tpu.matmul %159, %160, %cst_86 {dimension_numbers = #tpu.dot_dimension_numbers<[1], [1], [0], [0], [0, 0, 1, 0], [], []>} : vector<16x4xbf16>, vector<16x4xbf16>, vector<16x16xf32> -> vector<16x16xf32>
    %cst_87 = arith.constant 5.000000e-01 : f32
    %163 = vector.broadcast %cst_87 : f32 to vector<16x16xf32>
    %164 = arith.mulf %162, %163 : vector<16x16xf32>
    %cst_88 = arith.constant dense<0xFF800000> : vector<16xf32>
    %165 = vector.multi_reduction <maximumf>, %164, %cst_88 [1] : vector<16x16xf32> to vector<16xf32>
    %166 = vector.shape_cast %165 : vector<16xf32> to vector<16x1xf32>
    %167 = vector.broadcast %166 : vector<16x1xf32> to vector<16x16xf32>
    %168 = arith.subf %164, %167 : vector<16x16xf32>
    %169 = math.exp %168 : vector<16x16xf32>
    %170 = arith.mulf %169, %14 : vector<16x16xf32>
    %cst_89 = arith.constant dense<0.000000e+00> : vector<16xf32>
    %171 = vector.multi_reduction <add>, %170, %cst_89 [1] : vector<16x16xf32> to vector<16xf32>
    %172 = vector.shape_cast %171 : vector<16xf32> to vector<16x1xf32>
    %cst_90 = arith.constant 9.99999997E-7 : f32
    %173 = vector.broadcast %cst_90 : f32 to vector<16x1xf32>
    %174 = arith.addf %172, %173 : vector<16x1xf32>
    %cst_91 = arith.constant 6.24999998E-8 : f32
    %175 = vector.broadcast %cst_91 : f32 to vector<16x16xf32>
    %176 = arith.addf %170, %175 : vector<16x16xf32>
    %177 = tpu.reciprocal %174 {approx = true} : vector<16x1xf32> -> vector<16x1xf32>
    %178 = vector.broadcast %177 : vector<16x1xf32> to vector<16x16xf32>
    %179 = arith.mulf %176, %178 : vector<16x16xf32>
    %180 = arith.truncf %179 : vector<16x16xf32> to vector<16x16xbf16>
    %cst_92 = arith.constant dense<0.000000e+00> : vector<16x4xf32>
    %181 = tpu.matmul %180, %161, %cst_92 {dimension_numbers = #tpu.dot_dimension_numbers<[1], [0], [0], [1], [0, 0, 1, 1], [], []>} : vector<16x16xbf16>, vector<16x4xbf16>, vector<16x4xf32> -> vector<16x4xf32>
    %c0_93 = arith.constant 0 : index
    %c24_94 = arith.constant 24 : index
    %182 = vector.load %arg8[%c0_93, %c24_94] : memref<16x32xf32, #tpu.memory_space<vmem>>, vector<16x4xf32>
    tpu.vector_store %arg8[%c0_93, %c24_94], %181 {strides = array<i32>} : memref<16x32xf32, #tpu.memory_space<vmem>>, vector<16x4xf32>,
    %c0_95 = arith.constant 0 : index
    %c28 = arith.constant 28 : index
    %183 = vector.load %arg7[%c0_95, %c28] : memref<16x96xbf16, #tpu.memory_space<vmem>>, vector<16x4xbf16>
    %c0_96 = arith.constant 0 : index
    %c60 = arith.constant 60 : index
    %184 = vector.load %arg7[%c0_96, %c60] : memref<16x96xbf16, #tpu.memory_space<vmem>>, vector<16x4xbf16>
    %c0_97 = arith.constant 0 : index
    %c92 = arith.constant 92 : index
    %185 = vector.load %arg7[%c0_97, %c92] : memref<16x96xbf16, #tpu.memory_space<vmem>>, vector<16x4xbf16>
    %cst_98 = arith.constant dense<0.000000e+00> : vector<16x16xf32>
    %186 = tpu.matmul %183, %184, %cst_98 {dimension_numbers = #tpu.dot_dimension_numbers<[1], [1], [0], [0], [0, 0, 1, 0], [], []>} : vector<16x4xbf16>, vector<16x4xbf16>, vector<16x16xf32> -> vector<16x16xf32>
    %cst_99 = arith.constant 5.000000e-01 : f32
    %187 = vector.broadcast %cst_99 : f32 to vector<16x16xf32>
    %188 = arith.mulf %186, %187 : vector<16x16xf32>
    %cst_100 = arith.constant dense<0xFF800000> : vector<16xf32>
    %189 = vector.multi_reduction <maximumf>, %188, %cst_100 [1] : vector<16x16xf32> to vector<16xf32>
    %190 = vector.shape_cast %189 : vector<16xf32> to vector<16x1xf32>
    %191 = vector.broadcast %190 : vector<16x1xf32> to vector<16x16xf32>
    %192 = arith.subf %188, %191 : vector<16x16xf32>
    %193 = math.exp %192 : vector<16x16xf32>
    %194 = arith.mulf %193, %14 : vector<16x16xf32>
    %cst_101 = arith.constant dense<0.000000e+00> : vector<16xf32>
    %195 = vector.multi_reduction <add>, %194, %cst_101 [1] : vector<16x16xf32> to vector<16xf32>
    %196 = vector.shape_cast %195 : vector<16xf32> to vector<16x1xf32>
    %cst_102 = arith.constant 9.99999997E-7 : f32
    %197 = vector.broadcast %cst_102 : f32 to vector<16x1xf32>
    %198 = arith.addf %196, %197 : vector<16x1xf32>
    %cst_103 = arith.constant 6.24999998E-8 : f32
    %199 = vector.broadcast %cst_103 : f32 to vector<16x16xf32>
    %200 = arith.addf %194, %199 : vector<16x16xf32>
    %201 = tpu.reciprocal %198 {approx = true} : vector<16x1xf32> -> vector<16x1xf32>
    %202 = vector.broadcast %201 : vector<16x1xf32> to vector<16x16xf32>
    %203 = arith.mulf %200, %202 : vector<16x16xf32>
    %204 = arith.truncf %203 : vector<16x16xf32> to vector<16x16xbf16>
    %cst_104 = arith.constant dense<0.000000e+00> : vector<16x4xf32>
    %205 = tpu.matmul %204, %185, %cst_104 {dimension_numbers = #tpu.dot_dimension_numbers<[1], [0], [0], [1], [0, 0, 1, 1], [], []>} : vector<16x16xbf16>, vector<16x4xbf16>, vector<16x4xf32> -> vector<16x4xf32>
    %c0_105 = arith.constant 0 : index
    %c28_106 = arith.constant 28 : index
    %206 = vector.load %arg8[%c0_105, %c28_106] : memref<16x32xf32, #tpu.memory_space<vmem>>, vector<16x4xf32>
    tpu.vector_store %arg8[%c0_105, %c28_106], %205 {strides = array<i32>} : memref<16x32xf32, #tpu.memory_space<vmem>>, vector<16x4xf32>,
    %c0_107 = arith.constant 0 : index
    %c0_108 = arith.constant 0 : index
    %207 = vector.load %arg8[%c0_107, %c0_108] : memref<16x32xf32, #tpu.memory_space<vmem>>, vector<16x32xf32>
    %208 = arith.truncf %207 : vector<16x32xf32> to vector<16x32xbf16>
    %c0_109 = arith.constant 0 : index
    %c0_110 = arith.constant 0 : index
    %209 = vector.load %arg4[%c0_109, %c0_110] : memref<32x32xbf16, #tpu.memory_space<vmem>>, vector<32x32xbf16>
    %cst_111 = arith.constant dense<0.000000e+00> : vector<16x32xf32>
    %210 = tpu.matmul %208, %209, %cst_111 {dimension_numbers = #tpu.dot_dimension_numbers<[1], [0], [0], [1], [0, 0, 1, 1], [], []>} : vector<16x32xbf16>, vector<32x32xbf16>, vector<16x32xf32> -> vector<16x32xf32>
    %c0_112 = arith.constant 0 : index
    %c0_113 = arith.constant 0 : index
    %211 = vector.load %arg5[%c0_112, %c0_113] : memref<1x32xf32, #tpu.memory_space<vmem>>, vector<1x32xf32>
    %212 = vector.broadcast %211 : vector<1x32xf32> to vector<16x32xf32>
    %213 = arith.addf %210, %212 : vector<16x32xf32>
    %c0_114 = arith.constant 0 : index
    %c0_115 = arith.constant 0 : index
    %c0_116 = arith.constant 0 : index
    %214 = vector.load %arg6[%c0_114, %c0_115, %c0_116] : memref<1x16x32xf32, #tpu.memory_space<vmem>>, vector<1x16x32xf32>
    %215 = vector.shape_cast %214 : vector<1x16x32xf32> to vector<16x32xf32>
    %216 = vector.shape_cast %213 : vector<16x32xf32> to vector<1x16x32xf32>
    tpu.vector_store %arg6[%c0_114, %c0_115, %c0_116], %216 {strides = array<i32>} : memref<1x16x32xf32, #tpu.memory_space<vmem>>, vector<1x16x32xf32>,
    return
  }
  func.func @transform_0(%arg0: i32) -> (i32, i32, i32) {
    %c0_i32 = arith.constant 0 : i32
    %c0_i32_0 = arith.constant 0 : i32
    %c0_i32_1 = arith.constant 0 : i32
    return %arg0, %c0_i32, %c0_i32_0 : i32, i32, i32
  }
  func.func @transform_1(%arg0: i32) -> (i32, i32, i32) {
    %c0_i32 = arith.constant 0 : i32
    %c0_i32_0 = arith.constant 0 : i32
    %c0_i32_1 = arith.constant 0 : i32
    return %arg0, %c0_i32, %c0_i32_0 : i32, i32, i32
  }
  func.func @transform_2(%arg0: i32) -> (i32, i32) {
    %c0_i32 = arith.constant 0 : i32
    %c0_i32_0 = arith.constant 0 : i32
    %c0_i32_1 = arith.constant 0 : i32
    return %c0_i32, %c0_i32_0 : i32, i32
  }
  func.func @transform_3(%arg0: i32) -> (i32, i32) {
    %c0_i32 = arith.constant 0 : i32
    %c0_i32_0 = arith.constant 0 : i32
    %c0_i32_1 = arith.constant 0 : i32
    return %c0_i32, %c0_i32_0 : i32, i32
  }
  func.func @transform_4(%arg0: i32) -> (i32, i32) {
    %c0_i32 = arith.constant 0 : i32
    %c0_i32_0 = arith.constant 0 : i32
    %c0_i32_1 = arith.constant 0 : i32
    return %c0_i32, %c0_i32_0 : i32, i32
  }
  func.func @transform_5(%arg0: i32) -> (i32, i32, i32) {
    %c0_i32 = arith.constant 0 : i32
    %c0_i32_0 = arith.constant 0 : i32
    %c0_i32_1 = arith.constant 0 : i32
    return %arg0, %c0_i32, %c0_i32_0 : i32, i32, i32
  }
}

</mosaic_0001>

<bundles_post_ra>
// kernel: policy_attention_forward.1
= control target key start
LH: loop header
LB: loop body
LE: loop exit
PB: predicated region body
PF: predicated region fallthrough
CT: control target
= control target key end

     0   :  { %10 = vsyncpa [#allocation5], 0  ;;  %s2493_s0 = inlined_call_operand.vmem [shape: f32[2,1,16], index: 0, kind: input, shape index: {}]   ;;  %s2494_s1 = inlined_call_operand.vmem [shape: bf16[2,16,32], index: 1, kind: input, shape index: {}]   ;;  %s2495_s2 = inlined_call_operand.vmem [shape: bf16[32,96], index: 2, kind: input, shape index: {}]   ;;  %s2496_s3 = inlined_call_operand.vmem [shape: bf16[32,32], index: 3, kind: input, shape index: {}]   ;;  %s2497_s4 = inlined_call_operand.vmem [shape: f32[1,32], index: 4, kind: input, shape index: {}]   ;;  %s2498_s5 = inlined_call_operand.hbm [shape: f32[2,16,32], index: 5, kind: output, shape index: {}]  }
   0x1   :  { %12 = vsyncpa [#allocation5 + $0x1], 0  ;;  %s2067_s18 = smov 0   ;;  %s2069_s19 = smov 0  }
   0x2   :  { %s2071_s20 = smov 0   ;;  %s2073_s21 = smov 0  }
   0x3 LB: > { %s2088_s22 = sadd.s32 4294967295, %s2001_s21   ;;  %s1609_s23 = sadd.s32 4294967294, %s2001_s21   ;;  %s2001_s21 = sphi %s2073_s21, %s2504_s21   ;;  %s1997_s20 = sphi %s2071_s20, %s2503_s20   ;;  %s1993_s19 = sphi %s2069_s19, %s2502_s19   ;;  %s1989_s18 = sphi %s2067_s18, %s2501_s18  }
   0x4   : > { %s2092_s24 = sadd.s32 1, %s2001_s21   ;;  %s140_s25 = sadd.s32 1, %s1997_s20 }
   0x5   : > { %s137_s26 = ssub.s32 %s2001_s21, %s2092_s24  ;;  %p150_p0 = scmp.ne.s32.totalorder %s1997_s20, %s1993_s19 }
   0x6   : > { %p138_p1 = scmp.eq.s32.totalorder %s137_s26, 0  ;;  %p151_p2 = scmp.eq.s32.totalorder %s2088_s22, 1 }
   0x7   : > { %p156_p3 = scmp.ne.s32.totalorder %s1993_s19, %s1989_s18  ;;  %p157_p4 = scmp.eq.s32.totalorder %s1609_s23, 1 }
   0x8   : > { %s2103_s27 = scalar_select %p138_p1, %s1997_s20, %s140_s25  }
   0x9   : > { %p2105_p5 = por %p151_p2, %p150_p0  ;;  %p2109_p6 = por %p157_p4, %p156_p3 }
   0xa   : > { %p1612_p7 = scmp.ge.s32.totalorder %s2001_s21, 1  ;;  %p198_p8 = scmp.lt.s32.totalorder %s2001_s21, 3 }
   0xc   : > { %p199_p9 = pnand %p1612_p7, %p198_p8 }
   0xd   : > { %v1870_v0 = vld [vmem:[%s2495_s2] sm:$0xff] (!%p199_p9)   ;;  %v2003_v1 = vmov (!%p199_p9), 0.0   ;;  %v1871_v2 = vld [vmem:[%s2495_s2 + $0x8] sm:$0xff] (!%p199_p9)   ;;  %vm2004_vm0 = vmmov (!%p199_p9), 0   ;;  %p229_p10 = scmp.lt.s32.totalorder (!%p199_p9), %s2088_s22, 1  ;;  %vm261_vm1 = vcmask (!%p199_p9), 261120  }
   0xe   : > { %202 = sbr.rel (%p199_p9) target bundleno = 1580 (0x62c), region = 40  ;;  %1686 = vmatprep.subr.bf16.mxu0 (!%p199_p9), %v2003_v1  ;;  %1694 = vmatprep.subr.bf16.mxu1 (!%p199_p9), %v2003_v1  ;;  %vm307_vm2 = vcmask (!%p199_p9), 785408   ;;  %s2005_s14 = smov (!%p199_p9), 124   ;;  %vm329_vm3 = vcmask (!%p199_p9), 31744   ;;  %vm379_vm4 = vcmask (!%p199_p9), 130048   ;;  %vm597_vm7 = vcmask (!%p199_p9), 64544  }
   0xf   : > { %1687 = vmatpush3.bf16.msra.mxu0 (!%p199_p9), %v1870_v0  ;;  %1690 = vmatprep.mubr.msk.bf16.mxu0 (!%p199_p9), %vm2004_vm0, %v2003_v1  ;;  %s2006_s15 = smov (!%p199_p9), 96   ;;  %s2007_s16 = smov (!%p199_p9), 88   ;;  %vm739_vm8 = vcmask (!%p199_p9), 97344   ;;  %vm881_vm9 = vcmask (!%p199_p9), 130144   ;;  %vm1023_vm10 = vcmask (!%p199_p9), 162944   ;;  %vm1165_vm11 = vcmask (!%p199_p9), 195744  }
  0x10   : > { %1688 = vmatprep.subr.bf16.mxu0 (!%p199_p9), %v2003_v1  ;;  %1696 = vmatprep.mubr.msk.bf16.mxu1 (!%p199_p9), %vm2004_vm0, %v2003_v1  ;;  %s2008_s17 = smov (!%p199_p9), 92   ;;  %s2009_s23 = smov (!%p199_p9), 84   ;;  %vm1307_vm12 = vcmask (!%p199_p9), 228544   ;;  %vm1449_vm13 = vcmask (!%p199_p9), 261344  }
  0x11   : > { %s2010_s25 = smov (!%p199_p9), 120   ;;  %s2011_s26 = smov (!%p199_p9), 80  }
  0x12   : > { %s2012_s30 = smov (!%p199_p9), 116   ;;  %s2013_s6 = smov (!%p199_p9), 76  }
  0x13   : > { %1689 = vmatpush3.bf16.msra.mxu0 (!%p199_p9), %v1871_v2  ;;  %s2014_s7 = smov (!%p199_p9), 112   ;;  %s2015_s8 = smov (!%p199_p9), 72  }
  0x14   : > { %1700 = vmatprep.subr.bf16.mxu0 (!%p199_p9), %v2003_v1  ;;  %s2017_s11 = smov (!%p199_p9), 68   ;;  %s2018_s12 = smov (!%p199_p9), 104  }
  0x15   : > { %s2130_s9 = scalar_select %p229_p10, %s2088_s22, 1 }
  0x17   : > { %s1646_s10 = sshll.u32 %s2130_s9, 3 }
  0x18   : > { %s236_s13 = scalar_lea.vmem %s2494_s1, %s1646_s10  ;;  %s2016_s10 = smov 108  }
  0x19   : > { %v1872_v3 = vld [vmem:[%s236_s13] sm:$0xff]   ;;  %s2019_s13 = smov 100  }
  0x1a   : > { %1691 = vmatmul.mubr.msk.bf16.vlgmr.msra.gmra.mrb[0].mxu0 %vm261_vm1, %v1872_v3 }
  0x1b   : > { %1702 = vmatprep.mubr.msk.bf16.mxu0 %vm2004_vm0, %v2003_v1 }
  0xed   : > { %v299_v4 = vpop.f32.mrb[0].mxu0 }
  0xee   : > { %v1692_v5 = vpop.f32.mrb[1].mxu0 }
  0xef   : > { %v302_v6 = vpop.f32.mrb[2].mxu0 }
  0xf0   : > { %v306_v7 = vpack.c.bf16 %v302_v6, %v299_v4  ;;  %v1693_v8 = vpop.f32.mrb[3].mxu0 }
  0xf2   : > { %308 = vst.msk [vmem:[#allocation2] sm:$0xff] %vm307_vm2, %v306_v7 }
  0xf9   : > { %v2140_v9 = vld [vmem:[#allocation2] sm:$0xff] }
  0xfa   : > { %460 = vrot.lane.b32.xlu1 %v2140_v9, %s2005_s14  ;;  %327 = vrot.lane.b32.xlu0 %v2140_v9, %s2006_s15  ;;  %s2020_s14 = smov 64   ;;  %s2021_s15 = smov 60  }
  0xfe   : > { %604 = vrot.lane.b32.xlu1 %v2140_v9, %s2007_s16  ;;  %462 = vrot.lane.b32.xlu0 %v2140_v9, %s2008_s17  ;;  %s2022_s16 = smov 56   ;;  %s2023_s17 = smov 52  }
 0x102   : > { %746 = vrot.lane.b32.xlu1 %v2140_v9, %s2009_s23  ;;  %602 = vrot.lane.b32.xlu0 %v2140_v9, %s2010_s25  ;;  %s2033_s23 = smov 24   ;;  %s2034_s25 = smov 28  }
 0x106   : > { %888 = vrot.lane.b32.xlu1 %v2140_v9, %s2011_s26  ;;  %744 = vrot.lane.b32.xlu0 %v2140_v9, %s2012_s30  ;;  %s231_s26 = scalar_lea.vmem %s2493_s0, %s2130_s9  ;;  %s2024_s9 = smov 48  }
 0x107   : > { %s2025_s30 = smov 44  }
 0x10a   : > { %1030 = vrot.lane.b32.xlu1 %v2140_v9, %s2013_s6  ;;  %886 = vrot.lane.b32.xlu0 %v2140_v9, %s2014_s7  ;;  %s2026_s6 = smov 40   ;;  %s2027_s7 = smov 36  }
 0x10e   : > { %1172 = vrot.lane.b32.xlu1 %v2140_v9, %s2015_s8  ;;  %1028 = vrot.lane.b32.xlu0 %v2140_v9, %s2016_s10  ;;  %s2028_s8 = smov 4   ;;  %s2029_s10 = smov 8  }
 0x112   : > { %1314 = vrot.lane.b32.xlu1 %v2140_v9, %s2017_s11  ;;  %1170 = vrot.lane.b32.xlu0 %v2140_v9, %s2018_s12  ;;  %s2030_s11 = smov 12   ;;  %s2031_s12 = smov 16  }
 0x116   : > { %1312 = vrot.lane.b32.xlu0 %v2140_v9, %s2019_s13  ;;  %s2032_s13 = smov 20  }
 0x11a   : > { %409 = vrot.lane.b32.xlu0 %v2140_v9, %s2020_s14 }
 0x16c   : > { %v328_v10 = vpop.permute.xlu0 %327  ;;  %v461_v13 = vpop.permute.xlu1 %460 }
 0x16d   : > { %v334_v11 = vsel %vm329_vm3, %v328_v10, 0 }
 0x16e   : > { %1695 = vmatpush3.bf16.xpose.msra.mxu1 %v334_v11 }
 0x16f   : > { %1706 = vmatprep.subr.bf16.mxu1 %v2003_v1 }
 0x170   : > { %v463_v12 = vpop.permute.xlu0 %462  ;;  %v605_v17 = vpop.permute.xlu1 %604 }
 0x171   : > { %v468_v15 = vsel %vm329_vm3, %v463_v12, 0  ;;  %v610_v19 = vsel %vm329_vm3, %v605_v17, 0 }
 0x174   : > { %v603_v14 = vpop.permute.xlu0 %602  ;;  %v747_v21 = vpop.permute.xlu1 %746 }
 0x175   : > { %1697 = vmatmul.mubr.msk.bf16.vlgmr.msra.gmra.mrb[0].mxu1 %vm329_vm3, %v2140_v9  ;;  %v752_v23 = vsel %vm329_vm3, %v747_v21, 0 }
 0x176   : > { %1707 = vmatpush3.bf16.xpose.msra.mxu1 %v468_v15  ;;  %1708 = vmatprep.mubr.msk.bf16.mxu1 %vm2004_vm0, %v2003_v1 }
 0x177   : > { %1718 = vmatprep.subr.bf16.mxu1 %v2003_v1 }
 0x178   : > { %v745_v16 = vpop.permute.xlu0 %744  ;;  %v889_v25 = vpop.permute.xlu1 %888 }
 0x179   : > { %v894_v27 = vsel %vm329_vm3, %v889_v25, 0 }
 0x17c   : > { %v887_v18 = vpop.permute.xlu0 %886  ;;  %v1031_v28 = vpop.permute.xlu1 %1030 }
 0x17d   : > { %1709 = vmatmul.mubr.msk.bf16.vlgmr.msra.gmra.mrb[4].mxu1 %vm329_vm3, %v461_v13  ;;  %v1036_v29 = vsel %vm329_vm3, %v1031_v28, 0 }
 0x17e   : > { %1719 = vmatpush3.bf16.xpose.msra.mxu1 %v610_v19  ;;  %1720 = vmatprep.mubr.msk.bf16.mxu1 %vm2004_vm0, %v2003_v1 }
 0x17f   : > { %1730 = vmatprep.subr.bf16.mxu1 %v2003_v1 }
 0x180   : > { %v1029_v20 = vpop.permute.xlu0 %1028  ;;  %v1173_v30 = vpop.permute.xlu1 %1172 }
 0x181   : > { %v1178_v31 = vsel %vm329_vm3, %v1173_v30, 0 }
 0x184   : > { %v1171_v22 = vpop.permute.xlu0 %1170  ;;  %v1315_v32 = vpop.permute.xlu1 %1314 }
 0x185   : > { %1721 = vmatmul.mubr.msk.bf16.vlgmr.msra.gmra.mrb[8].mxu1 %vm329_vm3, %v603_v14  ;;  %v1320_v33 = vsel %vm329_vm3, %v1315_v32, 0 }
 0x186   : > { %1731 = vmatpush3.bf16.xpose.msra.mxu1 %v752_v23  ;;  %1732 = vmatprep.mubr.msk.bf16.mxu1 %vm2004_vm0, %v2003_v1 }
 0x187   : > { %1742 = vmatprep.subr.bf16.mxu1 %v2003_v1 }
 0x188   : > { %v1313_v24 = vpop.permute.xlu0 %1312 }
 0x18c   : > { %v410_v26 = vpop.permute.xlu0 %409 }
 0x18d   : > { %1701 = vmatpush3.bf16.msra.mxu0 %v410_v26  ;;  %1733 = vmatmul.mubr.msk.bf16.vlgmr.msra.gmra.mrb[12].mxu1 %vm329_vm3, %v745_v16 }
 0x18e   : > { %1743 = vmatpush3.bf16.xpose.msra.mxu1 %v894_v27  ;;  %1744 = vmatprep.mubr.msk.bf16.mxu1 %vm2004_vm0, %v2003_v1 }
 0x18f   : > { %1754 = vmatprep.subr.bf16.mxu1 %v2003_v1  ;;  %1712 = vmatprep.subr.bf16.mxu0 %v2003_v1 }
 0x195   : > { %1745 = vmatmul.mubr.msk.bf16.vlgmr.msra.gmra.mrb[16].mxu1 %vm329_vm3, %v887_v18 }
 0x196   : > { %1755 = vmatpush3.bf16.xpose.msra.mxu1 %v1036_v29  ;;  %1756 = vmatprep.mubr.msk.bf16.mxu1 %vm2004_vm0, %v2003_v1 }
 0x197   : > { %1766 = vmatprep.subr.bf16.mxu1 %v2003_v1 }
 0x19d   : > { %1757 = vmatmul.mubr.msk.bf16.vlgmr.msra.gmra.mrb[20].mxu1 %vm329_vm3, %v1029_v20 }
 0x19e   : > { %1767 = vmatpush3.bf16.xpose.msra.mxu1 %v1178_v31  ;;  %1768 = vmatprep.mubr.msk.bf16.mxu1 %vm2004_vm0, %v2003_v1 }
 0x19f   : > { %1778 = vmatprep.subr.bf16.mxu1 %v2003_v1 }
 0x1a5   : > { %1769 = vmatmul.mubr.msk.bf16.vlgmr.msra.gmra.mrb[24].mxu1 %vm329_vm3, %v1171_v22 }
 0x1a6   : > { %1779 = vmatpush3.bf16.xpose.msra.mxu1 %v1320_v33  ;;  %1780 = vmatprep.mubr.msk.bf16.mxu1 %vm2004_vm0, %v2003_v1 }
 0x1a7   : > { %1790 = vmatprep.subr.bf16.mxu1 %v2003_v1 }
 0x1ad   : > { %1781 = vmatmul.mubr.msk.bf16.vlgmr.msra.gmra.mrb[28].mxu1 %vm329_vm3, %v1313_v24 }
 0x1ae   : > { %1794 = vmatprep.mubr.msk.bf16.mxu1 %vm2004_vm0, %v2003_v1 }
 0x248   : > { %v370_v34 = vpop.f32.mrb[0].mxu1 }
 0x249   : > { %v2200_v35 = vmul.f32 0.5, %v370_v34  ;;  %v1698_v36 = vpop.f32.mrb[1].mxu1 }
 0x24a   : > { %v373_v37 = vpop.f32.mrb[2].mxu1 }
 0x24b   : > { %v2202_v38 = vmul.f32 0.5, %v373_v37  ;;  %v1699_v39 = vpop.f32.mrb[3].mxu1  ;;  %v380_v40 = vsel %vm379_vm4, %v2200_v35, -inf  ;;  %v310_v37 = vlaneseq }
 0x24c   : > { %381 = vmax.xlane.f32.xlu1 %v380_v40 }
 0x24d   : > { %v383_v41 = vsel %vm379_vm4, %v2202_v38, -inf }
 0x24e   : > { %384 = vmax.xlane.f32.xlu0 %v383_v41 }
 0x250   : > { %v504_v42 = vpop.f32.mrb[4].mxu1 }
 0x251   : > { %v2208_v43 = vmul.f32 0.5, %v504_v42  ;;  %v1710_v44 = vpop.f32.mrb[5].mxu1 }
 0x252   : > { %v507_v45 = vpop.f32.mrb[6].mxu1 }
 0x253   : > { %v2210_v46 = vmul.f32 0.5, %v507_v45  ;;  %v1711_v47 = vpop.f32.mrb[7].mxu1  ;;  %v513_v48 = vsel %vm379_vm4, %v2208_v43, -inf  ;;  %v311_v45 = vshrl.u32 %v310_v37, 7 }
 0x254   : > { %514 = vmax.xlane.f32.xlu0 %v513_v48  ;;  %v314_v48 = vand.u32 127, %v310_v37 }
 0x255   : > { %v516_v49 = vsel %vm379_vm4, %v2210_v46, -inf }
 0x256   : > { %517 = vmax.xlane.f32.xlu1 %v516_v49  ;;  %v312_v49 = vadd.s32 8, %v311_v45  ;;  %vm315_vm5 = vcmp.eq.s32.totalorder %v311_v45, %v314_v48 }
 0x258   : > { %v646_v50 = vpop.f32.mrb[8].mxu1  ;;  %vm316_vm6 = vcmp.eq.s32.totalorder %v312_v49, %v314_v48 }
 0x259   : > { %v2216_v51 = vmul.f32 0.5, %v646_v50  ;;  %v1722_v52 = vpop.f32.mrb[9].mxu1 }
 0x25a   : > { %v649_v53 = vpop.f32.mrb[10].mxu1 }
 0x25b   : > { %v1723_v54 = vpop.f32.mrb[11].mxu1  ;;  %v655_v55 = vsel %vm379_vm4, %v2216_v51, -inf  ;;  %v2241_v24 = vmul.f32 0.5, %v649_v53  ;;  %v1620_v53 = vld [vmem:[%s231_s26] ss:$0 sm:$0xff]  ;;  %s226_s26 = sand.u32 1, %s1993_s19  }
 0x25c   : > { %656 = vmax.xlane.f32.xlu0 %v655_v55 }
 0x25d   : > { %v658_v26 = vsel %vm379_vm4, %v2241_v24, -inf }
 0x260   : > { %v788_v56 = vpop.f32.mrb[12].mxu1 }
 0x261   : > { %v2220_v57 = vmul.f32 0.5, %v788_v56  ;;  %v1734_v58 = vpop.f32.mrb[13].mxu1 }
 0x262   : > { %v791_v59 = vpop.f32.mrb[14].mxu1 }
 0x263   : > { %v1735_v60 = vpop.f32.mrb[15].mxu1  ;;  %v797_v61 = vsel %vm379_vm4, %v2220_v57, -inf  ;;  %v2243_v25 = vmul.f32 0.5, %v791_v59  ;;  %v2277_v59 = vsel %vm316_vm6, 1.0, %v1620_v53 }
 0x264   : > { %798 = vmax.xlane.f32.xlu0 %v797_v61 }
 0x265   : > { %v800_v28 = vsel %vm379_vm4, %v2243_v25, -inf }
 0x267   : > { %542 = vrot.lane.b32.xlu1 %v2140_v9, %s2021_s15 }
 0x268   : > { %v930_v62 = vpop.f32.mrb[16].mxu1 }
 0x269   : > { %v2225_v63 = vmul.f32 0.5, %v930_v62  ;;  %v1746_v0 = vpop.f32.mrb[17].mxu1 }
 0x26a   : > { %v933_v2 = vpop.f32.mrb[18].mxu1 }
 0x26b   : > { %v1747_v3 = vpop.f32.mrb[19].mxu1  ;;  %v939_v4 = vsel %vm379_vm4, %v2225_v63, -inf  ;;  %v2247_v27 = vmul.f32 0.5, %v933_v2 }
 0x26c   : > { %940 = vmax.xlane.f32.xlu0 %v939_v4 }
 0x26d   : > { %v942_v30 = vsel %vm379_vm4, %v2247_v27, -inf }
 0x270   : > { %v1072_v5 = vpop.f32.mrb[20].mxu1 }
 0x271   : > { %v2229_v6 = vmul.f32 0.5, %v1072_v5  ;;  %v1758_v7 = vpop.f32.mrb[21].mxu1 }
 0x272   : > { %v1075_v8 = vpop.f32.mrb[22].mxu1 }
 0x273   : > { %v1759_v10 = vpop.f32.mrb[23].mxu1  ;;  %v1081_v11 = vsel %vm379_vm4, %v2229_v6, -inf  ;;  %v2251_v29 = vmul.f32 0.5, %v1075_v8 }
 0x274   : > { %1082 = vmax.xlane.f32.xlu0 %v1081_v11 }
 0x275   : > { %v1084_v32 = vsel %vm379_vm4, %v2251_v29, -inf }
 0x278   : > { %v1214_v12 = vpop.f32.mrb[24].mxu1 }
 0x279   : > { %v2233_v13 = vmul.f32 0.5, %v1214_v12  ;;  %v1770_v14 = vpop.f32.mrb[25].mxu1 }
 0x27a   : > { %v1217_v15 = vpop.f32.mrb[26].mxu1 }
 0x27b   : > { %v1771_v16 = vpop.f32.mrb[27].mxu1  ;;  %v1223_v17 = vsel %vm379_vm4, %v2233_v13, -inf  ;;  %v2255_v31 = vmul.f32 0.5, %v1217_v15 }
 0x27c   : > { %1224 = vmax.xlane.f32.xlu0 %v1223_v17 }
 0x27d   : > { %v1226_v34 = vsel %vm379_vm4, %v2255_v31, -inf }
 0x280   : > { %v1356_v18 = vpop.f32.mrb[28].mxu1 }
 0x281   : > { %v2237_v19 = vmul.f32 0.5, %v1356_v18  ;;  %v1782_v20 = vpop.f32.mrb[29].mxu1 }
 0x282   : > { %v1359_v21 = vpop.f32.mrb[30].mxu1 }
 0x283   : > { %v1783_v22 = vpop.f32.mrb[31].mxu1  ;;  %v1365_v23 = vsel %vm379_vm4, %v2237_v19, -inf  ;;  %v2259_v33 = vmul.f32 0.5, %v1359_v21 }
 0x284   : > { %1366 = vmax.xlane.f32.xlu0 %v1365_v23 }
 0x285   : > { %v1368_v36 = vsel %vm379_vm4, %v2259_v33, -inf }
 0x28b   : > { %659 = vmax.xlane.f32.xlu1 %v658_v26 }
 0x28f   : > { %801 = vmax.xlane.f32.xlu1 %v800_v28 }
 0x293   : > { %943 = vmax.xlane.f32.xlu1 %v942_v30 }
 0x297   : > { %1085 = vmax.xlane.f32.xlu1 %v1084_v32 }
 0x29a   : > { %684 = vrot.lane.b32.xlu0 %v2140_v9, %s2022_s16  ;;  %s2035_s16 = smov [#allocation4]  }
 0x29b   : > { %1227 = vmax.xlane.f32.xlu1 %v1226_v34 }
 0x29f   : > { %1369 = vmax.xlane.f32.xlu1 %v1368_v36 }
 0x2b0   : > { %826 = vrot.lane.b32.xlu1 %v2140_v9, %s2023_s17  ;;  %s1943_s17 = sshll.u32 %s2035_s16, 4  ;;  %s1944_s17 = int_to_ptr.vmem [resolvable:$false] %s1943_s17 }
 0x2d9   : > { %v382_v39 = vpop.xlane.xlu1 %381 }
 0x2da   : > { %v386_v40 = vsub.f32 %v2200_v35, %v382_v39 }
 0x2db   : > { %v385_v41 = vpop.xlane.xlu0 %384 }
 0x2dc   : > { %v388_v42 = vmul.f32 1.442695, %v386_v40  ;;  %v387_v44 = vsub.f32 %v2202_v38, %v385_v41  ;;  %v2275_v38 = vsel %vm315_vm5, 1.0, %v1620_v53 }
 0x2de   : > { %1875 = vpow2.f32 %v388_v42  ;;  %v390_v47 = vmul.f32 1.442695, %v387_v44 }
 0x2e0   : > { %1877 = vpow2.f32 %v390_v47 }
 0x2e1   : > { %v515_v50 = vpop.xlane.xlu0 %514 }
 0x2e2   : > { %v519_v52 = vsub.f32 %v2208_v43, %v515_v50 }
 0x2e3   : > { %v518_v35 = vpop.xlane.xlu1 %517 }
 0x2e4   : > { %v521_v54 = vmul.f32 1.442695, %v519_v52  ;;  %v520_v55 = vsub.f32 %v2210_v46, %v518_v35 }
 0x2e6   : > { %1879 = vpow2.f32 %v521_v54  ;;  %v523_v56 = vmul.f32 1.442695, %v520_v55 }
 0x2e7   : > { %v2317_v34 = vpop.permute.xlu1 %542 }
 0x2e8   : > { %v1876_v58 = vpop.eup %1875  ;;  %1881 = vpow2.f32 %v523_v56 }
 0x2e9   : > { %v657_v60 = vpop.xlane.xlu0 %656  ;;  %v2280_v61 = vmul.f32 %v1876_v58, %v2275_v38 }
 0x2ea   : > { %v1878_v43 = vpop.eup %1877  ;;  %v661_v62 = vsub.f32 %v2216_v51, %v657_v60 }
 0x2eb   : > { %v394_v0 = vsel %vm379_vm4, %v2280_v61, 0.0  ;;  %v2286_v46 = vmul.f32 %v1878_v43, %v2277_v59 }
 0x2ec   : > { %v663_v2 = vmul.f32 1.442695, %v661_v62  ;;  %395 = vadd.xlane.f32.xlu0 %v394_v0 }
 0x2ed   : > { %v397_v3 = vsel %vm379_vm4, %v2286_v46, 0.0 }
 0x2ee   : > { %1883 = vpow2.f32 %v663_v2  ;;  %398 = vadd.xlane.f32.xlu1 %v397_v3 }
 0x2f0   : > { %v1880_v4 = vpop.eup %1879 }
 0x2f1   : > { %v799_v5 = vpop.xlane.xlu0 %798  ;;  %v2291_v7 = vmul.f32 %v1880_v4, %v2275_v38 }
 0x2f2   : > { %v1882_v8 = vpop.eup %1881  ;;  %v803_v51 = vsub.f32 %v2220_v57, %v799_v5 }
 0x2f3   : > { %v527_v10 = vsel %vm379_vm4, %v2291_v7, 0.0  ;;  %v2297_v11 = vmul.f32 %v1882_v8, %v2277_v59 }
 0x2f4   : > { %v805_v12 = vmul.f32 1.442695, %v803_v51  ;;  %528 = vadd.xlane.f32.xlu0 %v527_v10 }
 0x2f5   : > { %v530_v14 = vsel %vm379_vm4, %v2297_v11, 0.0 }
 0x2f6   : > { %1885 = vpow2.f32 %v805_v12  ;;  %531 = vadd.xlane.f32.xlu1 %v530_v14 }
 0x2f8   : > { %v1884_v15 = vpop.eup %1883 }
 0x2f9   : > { %v2302_v16 = vmul.f32 %v1884_v15, %v2275_v38  ;;  %v941_v17 = vpop.xlane.xlu0 %940 }
 0x2fa   : > { %v945_v36 = vsub.f32 %v2225_v63, %v941_v17 }
 0x2fb   : > { %v669_v57 = vsel %vm379_vm4, %v2302_v16, 0.0 }
 0x2fc   : > { %670 = vadd.xlane.f32.xlu0 %v669_v57  ;;  %v947_v40 = vmul.f32 1.442695, %v945_v36 }
 0x300   : > { %v1886_v18 = vpop.eup %1885 }
 0x301   : > { %v1083_v20 = vpop.xlane.xlu0 %1082  ;;  %v2307_v21 = vmul.f32 %v1886_v18, %v2275_v38 }
 0x302   : > { %v1087_v22 = vsub.f32 %v2229_v6, %v1083_v20 }
 0x303   : > { %v811_v23 = vsel %vm379_vm4, %v2307_v21, 0.0 }
 0x304   : > { %v1089_v26 = vmul.f32 1.442695, %v1087_v22  ;;  %812 = vadd.xlane.f32.xlu0 %v811_v23 }
 0x306   : > { %1887 = vpow2.f32 %v1089_v26 }
 0x309   : > { %v1225_v48 = vpop.xlane.xlu0 %1224 }
 0x30a   : > { %v1229_v63 = vsub.f32 %v2233_v13, %v1225_v48  ;;  %v402_v48 = vadd.f32 6.25e-08, %v2280_v61 }
 0x310   : > { %v1888_v28 = vpop.eup %1887 }
 0x311   : > { %v2313_v30 = vmul.f32 %v1888_v28, %v2275_v38 }
 0x313   : > { %v1095_v32 = vsel %vm379_vm4, %v2313_v30, 0.0 }
 0x314   : > { %1096 = vadd.xlane.f32.xlu0 %v1095_v32 }
 0x318   : > { %v660_v37 = vpop.xlane.xlu1 %659 }
 0x319   : > { %v662_v6 = vsub.f32 %v2241_v24, %v660_v37 }
 0x31b   : > { %v665_v39 = vmul.f32 1.442695, %v662_v6 }
 0x31c   : > { %v802_v41 = vpop.xlane.xlu1 %801 }
 0x31d   : > { %1889 = vpow2.f32 %v665_v39  ;;  %v804_v42 = vsub.f32 %v2243_v25, %v802_v41  ;;  %v1231_v25 = vmul.f32 1.442695, %v1229_v63 }
 0x31e   : > { %1891 = vpow2.f32 %v947_v40 }
 0x31f   : > { %v807_v44 = vmul.f32 1.442695, %v804_v42 }
 0x320   : > { %v944_v45 = vpop.xlane.xlu1 %943 }
 0x321   : > { %1893 = vpow2.f32 %v807_v44  ;;  %v946_v47 = vsub.f32 %v2247_v27, %v944_v45 }
 0x323   : > { %v949_v49 = vmul.f32 1.442695, %v946_v47 }
 0x324   : > { %v1086_v50 = vpop.xlane.xlu1 %1085 }
 0x325   : > { %1895 = vpow2.f32 %v949_v49  ;;  %v1088_v24 = vsub.f32 %v2251_v29, %v1086_v50  ;;  %v1367_v29 = vpop.xlane.xlu0 %1366 }
 0x326   : > { %v1371_v3 = vsub.f32 %v2237_v19, %v1367_v29 }
 0x327   : > { %v1890_v52 = vpop.eup %1889  ;;  %v1091_v53 = vmul.f32 1.442695, %v1088_v24 }
 0x328   : > { %v1228_v35 = vpop.xlane.xlu1 %1227  ;;  %v2326_v54 = vmul.f32 %v1890_v52, %v2277_v59  ;;  %v1892_v56 = vpop.eup %1891 }
 0x329   : > { %1897 = vpow2.f32 %v1091_v53  ;;  %v1230_v55 = vsub.f32 %v2255_v31, %v1228_v35  ;;  %v2339_v0 = vmul.f32 %v1892_v56, %v2275_v38  ;;  %v535_v53 = vadd.f32 6.25e-08, %v2291_v7 }
 0x32a   : > { %968 = vrot.lane.b32.xlu0 %v2140_v9, %s2024_s9  ;;  %v672_v13 = vsel %vm379_vm4, %v2326_v54, 0.0  ;;  %1899 = vpow2.f32 %v1231_v25  ;;  %v536_v35 = vadd.f32 6.25e-08, %v2297_v11  ;;  %s1613_s9 = sshll.u32 %s226_s26, 4 }
 0x32b   : > { %v1894_v27 = vpop.eup %1893  ;;  %673 = vadd.xlane.f32.xlu1 %v672_v13  ;;  %v1233_v43 = vmul.f32 1.442695, %v1230_v55  ;;  %v953_v5 = vsel %vm379_vm4, %v2339_v0, 0.0 }
 0x32c   : > { %v1370_v58 = vpop.xlane.xlu1 %1369  ;;  %v2333_v60 = vmul.f32 %v1894_v27, %v2277_v59 }
 0x32d   : > { %v1372_v62 = vsub.f32 %v2259_v33, %v1370_v58  ;;  %1901 = vpow2.f32 %v1233_v43  ;;  %v1373_v33 = vmul.f32 1.442695, %v1371_v3  ;;  %v677_v3 = vadd.f32 6.25e-08, %v2302_v16 }
 0x32e   : > { %v814_v31 = vsel %vm379_vm4, %v2333_v60, 0.0 }
 0x32f   : > { %v1896_v2 = vpop.eup %1895  ;;  %815 = vadd.xlane.f32.xlu1 %v814_v31  ;;  %v1375_v4 = vmul.f32 1.442695, %v1372_v62 }
 0x330   : > { %v2345_v8 = vmul.f32 %v1896_v2, %v2277_v59 }
 0x331   : > { %1903 = vpow2.f32 %v1375_v4  ;;  %v678_v4 = vadd.f32 6.25e-08, %v2326_v54 }
 0x332   : > { %v956_v10 = vsel %vm379_vm4, %v2345_v8, 0.0  ;;  %1905 = vpow2.f32 %v1373_v33 }
 0x333   : > { %v1898_v51 = vpop.eup %1897  ;;  %954 = vadd.xlane.f32.xlu1 %v953_v5 }
 0x334   : > { %v2350_v12 = vmul.f32 %v1898_v51, %v2277_v59  ;;  %v1900_v19 = vpop.eup %1899 }
 0x335   : > { %v2355_v15 = vmul.f32 %v1900_v19, %v2275_v38 }
 0x336   : > { %v1098_v14 = vsel %vm379_vm4, %v2350_v12, 0.0 }
 0x337   : > { %957 = vadd.xlane.f32.xlu1 %v956_v10  ;;  %v1902_v57 = vpop.eup %1901  ;;  %v1237_v17 = vsel %vm379_vm4, %v2355_v15, 0.0 }
 0x338   : > { %v2360_v18 = vmul.f32 %v1902_v57, %v2277_v59 }
 0x33a   : > { %v1240_v23 = vsel %vm379_vm4, %v2360_v18, 0.0 }
 0x33b   : > { %1099 = vadd.xlane.f32.xlu1 %v1098_v14  ;;  %v1904_v20 = vpop.eup %1903 }
 0x33c   : > { %v1906_v22 = vpop.eup %1905  ;;  %v2365_v26 = vmul.f32 %v1904_v20, %v2277_v59  ;;  %v685_v59 = vpop.permute.xlu0 %684  ;;  %v820_v20 = vadd.f32 6.25e-08, %v2333_v60 }
 0x33d   : > { %v2368_v28 = vmul.f32 %v1906_v22, %v2275_v38  ;;  %v2377_v38 = vpop.permute.xlu1 %826 }
 0x33e   : > { %v1382_v32 = vsel %vm379_vm4, %v2365_v26, 0.0 }
 0x33f   : > { %1238 = vadd.xlane.f32.xlu1 %v1237_v17  ;;  %v1379_v36 = vsel %vm379_vm4, %v2368_v28, 0.0  ;;  %v819_v17 = vadd.f32 6.25e-08, %v2307_v21 }
 0x343   : > { %1241 = vadd.xlane.f32.xlu1 %v1240_v23 }
 0x347   : > { %1383 = vadd.xlane.f32.xlu1 %v1382_v32 }
 0x349   : > { %1380 = vadd.xlane.f32.xlu0 %v1379_v36 }
 0x358   : > { %1110 = vrot.lane.b32.xlu1 %v2140_v9, %s2025_s30 }
 0x35f   : > { %1252 = vrot.lane.b32.xlu0 %v2140_v9, %s2026_s6 }
 0x363   : > { %1394 = vrot.lane.b32.xlu0 %v2140_v9, %s2027_s7  ;;  %v403_v9 = vadd.f32 6.25e-08, %v2286_v46  ;;  %s228_s7 = scalar_lea.vmem [#allocation4], %s1613_s9 }
 0x379   : > { %v396_v37 = vpop.xlane.xlu0 %395 }
 0x37a   : > { %v400_v6 = vadd.f32 1e-06, %v396_v37 }
 0x37b   : > { %v399_v39 = vpop.xlane.xlu1 %398 }
 0x37c   : > { %1907 = vrcp.f32 %v400_v6  ;;  %v401_v40 = vadd.f32 1e-06, %v399_v39  ;;  %v961_v6 = vadd.f32 6.25e-08, %v2339_v0  ;;  %v962_v39 = vadd.f32 6.25e-08, %v2345_v8 }
 0x37d   : > { %v1104_v0 = vadd.f32 6.25e-08, %v2350_v12  ;;  %v1246_v12 = vadd.f32 6.25e-08, %v2360_v18 }
 0x37e   : > { %1909 = vrcp.f32 %v401_v40 }
 0x381   : > { %v529_v41 = vpop.xlane.xlu0 %528 }
 0x382   : > { %v533_v42 = vadd.f32 1e-06, %v529_v41 }
 0x383   : > { %v532_v44 = vpop.xlane.xlu1 %531 }
 0x384   : > { %1911 = vrcp.f32 %v533_v42  ;;  %v534_v45 = vadd.f32 1e-06, %v532_v44 }
 0x386   : > { %v1908_v47 = vpop.eup %1907  ;;  %1913 = vrcp.f32 %v534_v45 }
 0x387   : > { %v406_v50 = vmul.f32 %v1908_v47, %v402_v48  ;;  %v1103_v48 = vadd.f32 6.25e-08, %v2313_v30  ;;  %v1245_v30 = vadd.f32 6.25e-08, %v2355_v15 }
 0x388   : > { %v1910_v49 = vpop.eup %1909 }
 0x389   : > { %v407_v63 = vmul.f32 %v1910_v49, %v403_v9 }
 0x38b   : > { %v408_v24 = vpack.c.bf16 %v407_v63, %v406_v50 }
 0x38d   : > { %1703 = vmatmul.mubr.msk.bf16.vlgmr.msra.gmra.mrb[4].mxu0 %vm379_vm4, %v408_v24 }
 0x38e   : > { %v1912_v52 = vpop.eup %1911  ;;  %1713 = vmatpush3.bf16.msra.mxu0 %v2317_v34  ;;  %1714 = vmatprep.mubr.msk.bf16.mxu0 %vm2004_vm0, %v2003_v1  ;;  %v671_v34 = vpop.xlane.xlu0 %670 }
 0x38f   : > { %1724 = vmatprep.subr.bf16.mxu0 %v2003_v1  ;;  %v539_v46 = vmul.f32 %v1912_v52, %v535_v53  ;;  %v675_v56 = vadd.f32 1e-06, %v671_v34 }
 0x390   : > { %v1914_v61 = vpop.eup %1913 }
 0x391   : > { %v540_v25 = vmul.f32 %v1914_v61, %v536_v35  ;;  %1915 = vrcp.f32 %v675_v56 }
 0x392   : > { %v813_v13 = vpop.xlane.xlu0 %812 }
 0x393   : > { %v541_v55 = vpack.c.bf16 %v540_v25, %v539_v46  ;;  %v817_v11 = vadd.f32 1e-06, %v813_v13 }
 0x395   : > { %1715 = vmatmul.mubr.msk.bf16.vlgmr.msra.gmra.mrb[8].mxu0 %vm379_vm4, %v541_v55 }
 0x396   : > { %1725 = vmatpush3.bf16.msra.mxu0 %v685_v59  ;;  %1726 = vmatprep.mubr.msk.bf16.mxu0 %vm2004_vm0, %v2003_v1 }
 0x397   : > { %1736 = vmatprep.subr.bf16.mxu0 %v2003_v1 }
 0x39b   : > { %v1916_v2 = vpop.eup %1915 }
 0x39c   : > { %v681_v19 = vmul.f32 %v1916_v2, %v677_v3 }
 0x3a1   : > { %v1097_v31 = vpop.xlane.xlu0 %1096 }
 0x3a2   : > { %v1101_v33 = vadd.f32 1e-06, %v1097_v31 }
 0x3a5   : > { %v969_v44 = vpop.permute.xlu0 %968 }
 0x3b8   : > { %v674_v7 = vpop.xlane.xlu1 %673 }
 0x3b9   : > { %v676_v27 = vadd.f32 1e-06, %v674_v7  ;;  %v1388_v7 = vadd.f32 6.25e-08, %v2365_v26 }
 0x3bb   : > { %1917 = vrcp.f32 %v676_v27 }
 0x3bc   : > { %v816_v29 = vpop.xlane.xlu1 %815  ;;  %1919 = vrcp.f32 %v817_v11  ;;  %v1387_v11 = vadd.f32 6.25e-08, %v2368_v28 }
 0x3bd   : > { %v818_v58 = vadd.f32 1e-06, %v816_v29 }
 0x3bf   : > { %1921 = vrcp.f32 %v818_v58 }
 0x3c0   : > { %v955_v43 = vpop.xlane.xlu1 %954 }
 0x3c1   : > { %v959_v62 = vadd.f32 1e-06, %v955_v43 }
 0x3c3   : > { %1923 = vrcp.f32 %v959_v62 }
 0x3c4   : > { %v958_v5 = vpop.xlane.xlu1 %957 }
 0x3c5   : > { %v1918_v51 = vpop.eup %1917  ;;  %v960_v10 = vadd.f32 1e-06, %v958_v5 }
 0x3c6   : > { %v682_v14 = vmul.f32 %v1918_v51, %v678_v4  ;;  %v1920_v57 = vpop.eup %1919 }
 0x3c7   : > { %1925 = vrcp.f32 %v960_v10  ;;  %v823_v36 = vmul.f32 %v1920_v57, %v819_v17 }
 0x3c8   : > { %v1100_v22 = vpop.xlane.xlu1 %1099  ;;  %v683_v23 = vpack.c.bf16 %v682_v14, %v681_v19  ;;  %1927 = vrcp.f32 %v1101_v33 }
 0x3c9   : > { %v1922_v32 = vpop.eup %1921  ;;  %v1102_v16 = vadd.f32 1e-06, %v1100_v22 }
 0x3ca   : > { %v824_v54 = vmul.f32 %v1922_v32, %v820_v20  ;;  %1727 = vmatmul.mubr.msk.bf16.vlgmr.msra.gmra.mrb[12].mxu0 %vm379_vm4, %v683_v23 }
 0x3cb   : > { %1929 = vrcp.f32 %v1102_v16  ;;  %1737 = vmatpush3.bf16.msra.mxu0 %v2377_v38  ;;  %1738 = vmatprep.mubr.msk.bf16.mxu0 %vm2004_vm0, %v2003_v1 }
 0x3cc   : > { %v1239_v59 = vpop.xlane.xlu1 %1238  ;;  %1748 = vmatprep.subr.bf16.mxu0 %v2003_v1  ;;  %v825_v21 = vpack.c.bf16 %v824_v54, %v823_v36 }
 0x3cd   : > { %v1243_v60 = vadd.f32 1e-06, %v1239_v59  ;;  %v1924_v37 = vpop.eup %1923 }
 0x3ce   : > { %v965_v45 = vmul.f32 %v1924_v37, %v961_v6  ;;  %v1874_v6 = vld [vmem:[%s2496_s3 + $0x8] sm:$0xff]  }
 0x3cf   : > { %1931 = vrcp.f32 %v1243_v60  ;;  %v1873_v60 = vld [vmem:[%s2496_s3] sm:$0xff]  }
 0x3d0   : > { %v1242_v40 = vpop.xlane.xlu1 %1241  ;;  %1791 = vmatpush3.bf16.msra.mxu1 %v1873_v60 }
 0x3d1   : > { %v1926_v41 = vpop.eup %1925  ;;  %v1244_v42 = vadd.f32 1e-06, %v1242_v40  ;;  %1792 = vmatprep.subr.bf16.mxu1 %v2003_v1 }
 0x3d2   : > { %v966_v38 = vmul.f32 %v1926_v41, %v962_v39  ;;  %1739 = vmatmul.mubr.msk.bf16.vlgmr.msra.gmra.mrb[16].mxu0 %vm379_vm4, %v825_v21  ;;  %v1928_v47 = vpop.eup %1927 }
 0x3d3   : > { %1933 = vrcp.f32 %v1244_v42  ;;  %1749 = vmatpush3.bf16.msra.mxu0 %v969_v44  ;;  %1750 = vmatprep.mubr.msk.bf16.mxu0 %vm2004_vm0, %v2003_v1  ;;  %v1107_v63 = vmul.f32 %v1928_v47, %v1103_v48 }
 0x3d4   : > { %v1384_v8 = vpop.xlane.xlu1 %1383  ;;  %1760 = vmatprep.subr.bf16.mxu0 %v2003_v1  ;;  %v967_v9 = vpack.c.bf16 %v966_v38, %v965_v45  ;;  %1793 = vmatpush3.bf16.msra.mxu1 %v1874_v6 }
 0x3d5   : > { %v1930_v49 = vpop.eup %1929  ;;  %v1386_v50 = vadd.f32 1e-06, %v1384_v8 }
 0x3d6   : > { %v1108_v24 = vmul.f32 %v1930_v49, %v1104_v0  ;;  %v1381_v52 = vpop.xlane.xlu0 %1380 }
 0x3d7   : > { %1935 = vrcp.f32 %v1386_v50  ;;  %v1385_v53 = vadd.f32 1e-06, %v1381_v52 }
 0x3d8   : > { %v1111_v35 = vpop.permute.xlu1 %1110  ;;  %v1109_v61 = vpack.c.bf16 %v1108_v24, %v1107_v63 }
 0x3d9   : > { %1937 = vrcp.f32 %v1385_v53  ;;  %v1932_v46 = vpop.eup %1931 }
 0x3da   : > { %1751 = vmatmul.mubr.msk.bf16.vlgmr.msra.gmra.mrb[20].mxu0 %vm379_vm4, %v967_v9  ;;  %v1249_v55 = vmul.f32 %v1932_v46, %v1245_v30  ;;  %v1253_v27 = vpop.permute.xlu0 %1252 }
 0x3db   : > { %1761 = vmatpush3.bf16.msra.mxu0 %v1111_v35  ;;  %1762 = vmatprep.mubr.msk.bf16.mxu0 %vm2004_vm0, %v2003_v1 }
 0x3dc   : > { %1772 = vmatprep.subr.bf16.mxu0 %v2003_v1 }
 0x3dd   : > { %v1934_v25 = vpop.eup %1933 }
 0x3de   : > { %v1250_v34 = vmul.f32 %v1934_v25, %v1246_v12  ;;  %v1395_v43 = vpop.permute.xlu0 %1394  ;;  %v1637_v25 = vld [vmem:[%s2497_s4] ss:$0 sm:$0xff] }
 0x3e0   : > { %v1251_v56 = vpack.c.bf16 %v1250_v34, %v1249_v55 }
 0x3e1   : > { %v1936_v13 = vpop.eup %1935 }
 0x3e2   : > { %1763 = vmatmul.mubr.msk.bf16.vlgmr.msra.gmra.mrb[24].mxu0 %vm379_vm4, %v1109_v61  ;;  %v1392_v15 = vmul.f32 %v1936_v13, %v1388_v7 }
 0x3e3   : > { %v1938_v29 = vpop.eup %1937  ;;  %1773 = vmatpush3.bf16.msra.mxu0 %v1253_v27  ;;  %1774 = vmatprep.mubr.msk.bf16.mxu0 %vm2004_vm0, %v2003_v1 }
 0x3e4   : > { %v1391_v18 = vmul.f32 %v1938_v29, %v1387_v11  ;;  %1784 = vmatprep.subr.bf16.mxu0 %v2003_v1 }
 0x3e6   : > { %v1393_v58 = vpack.c.bf16 %v1392_v15, %v1391_v18 }
 0x3ea   : > { %1775 = vmatmul.mubr.msk.bf16.vlgmr.msra.gmra.mrb[28].mxu0 %vm379_vm4, %v1251_v56 }
 0x3eb   : > { %1785 = vmatpush3.bf16.msra.mxu0 %v1395_v43  ;;  %1786 = vmatprep.mubr.msk.bf16.mxu0 %vm2004_vm0, %v2003_v1 }
 0x3f2   : > { %1787 = vmatmul.mubr.msk.bf16.vlgmr.msra.gmra.mrb[32].mxu0 %vm379_vm4, %v1393_v58 }
 0x460   : > { %v449_v26 = vpop.f32.mrb[4].mxu0 }
 0x461   : > { %456 = vst.msk [vmem:[#allocation3] sm:$0xff] %vm329_vm3, %v449_v26  ;;  %v1704_v28 = vpop.f32.mrb[5].mxu0 }
 0x462   : > { %v452_v62 = vpop.f32.mrb[6].mxu0 }
 0x463   : > { %457 = vst.msk [vmem:[#allocation3 + $0x8] sm:$0xff] %vm329_vm3, %v452_v62  ;;  %v1705_v31 = vpop.f32.mrb[7].mxu0 }
 0x468   : > { %v582_v2 = vpop.f32.mrb[8].mxu0 }
 0x469   : > { %591 = vrot.lane.b32.xlu0 %v582_v2, %s2028_s8  ;;  %v1716_v3 = vpop.f32.mrb[9].mxu0 }
 0x46a   : > { %v585_v4 = vpop.f32.mrb[10].mxu0 }
 0x46b   : > { %v1717_v5 = vpop.f32.mrb[11].mxu0 }
 0x46d   : > { %593 = vrot.lane.b32.xlu0 %v585_v4, %s2028_s8  ;;  %s1538_s8 = sshll.u32 %s228_s7, 4  ;;  %s2442_s8 = int_to_ptr.vmem [resolvable:$true] %s1538_s8 }
 0x46e   : > { %s1939_s15 = scalar_lea.vmem %s2442_s8, 256  ;;  %p1946_p0 = scmp.lt.s32.totalorder %s2442_s8, %s1944_s17 }
 0x46f   : > { %p1940_p11 = scmp.ne.s32.totalorder %s2442_s8, %s1939_s15 }
 0x471   : > { %p1941_p12 = pnand %p1940_p11, %p2105_p5 }
 0x473   : > { %p1942_p13 = pneg %p1941_p12 }
 0x49d   : > { %v724_v51 = vpop.f32.mrb[12].mxu0 }
 0x49e   : > { %733 = vrot.lane.b32.xlu1 %v724_v51, %s2029_s10  ;;  %v1728_v33 = vpop.f32.mrb[13].mxu0 }
 0x49f   : > { %v727_v10 = vpop.f32.mrb[14].mxu0 }
 0x4a0   : > { %735 = vrot.lane.b32.xlu0 %v727_v10, %s2029_s10  ;;  %v1729_v19 = vpop.f32.mrb[15].mxu0 }
 0x4a5   : > { %v866_v14 = vpop.f32.mrb[16].mxu0 }
 0x4a6   : > { %875 = vrot.lane.b32.xlu1 %v866_v14, %s2030_s11  ;;  %v1740_v57 = vpop.f32.mrb[17].mxu0 }
 0x4a7   : > { %v869_v17 = vpop.f32.mrb[18].mxu0 }
 0x4a8   : > { %877 = vrot.lane.b32.xlu0 %v869_v17, %s2030_s11  ;;  %v1741_v20 = vpop.f32.mrb[19].mxu0  ;;  %s1647_s11 = sshll.u32 %s2088_s22, 8  ;;  %s2451_s22 = scalar_lea.sflag [#allocation5], %s226_s26 }
 0x4a9   : > { %s2448_s14 = scalar_lea.hbm %s2498_s5, %s1647_s11 }
 0x4ad   : > { %v1008_v22 = vpop.f32.mrb[20].mxu0 }
 0x4ae   : > { %1017 = vrot.lane.b32.xlu1 %v1008_v22, %s2031_s12  ;;  %v1752_v23 = vpop.f32.mrb[21].mxu0 }
 0x4af   : > { %v1011_v32 = vpop.f32.mrb[22].mxu0 }
 0x4b0   : > { %1019 = vrot.lane.b32.xlu0 %v1011_v32, %s2031_s12  ;;  %v1753_v16 = vpop.f32.mrb[23].mxu0 }
 0x4b5   : > { %v1150_v36 = vpop.f32.mrb[24].mxu0 }
 0x4b6   : > { %1159 = vrot.lane.b32.xlu1 %v1150_v36, %s2032_s13  ;;  %v1764_v54 = vpop.f32.mrb[25].mxu0 }
 0x4b7   : > { %v1153_v59 = vpop.f32.mrb[26].mxu0 }
 0x4b8   : > { %1161 = vrot.lane.b32.xlu0 %v1153_v59, %s2032_s13  ;;  %v1765_v21 = vpop.f32.mrb[27].mxu0 }
 0x4bd   : > { %v1292_v37 = vpop.f32.mrb[28].mxu0 }
 0x4be   : > { %1301 = vrot.lane.b32.xlu1 %v1292_v37, %s2033_s23  ;;  %v1776_v39 = vpop.f32.mrb[29].mxu0 }
 0x4bf   : > { %v1295_v40 = vpop.f32.mrb[30].mxu0 }
 0x4c0   : > { %1303 = vrot.lane.b32.xlu0 %v1295_v40, %s2033_s23  ;;  %v1777_v41 = vpop.f32.mrb[31].mxu0  ;;  %s1945_s23 = scalar_lea.vmem %s1944_s17, 512 }
 0x4c1   : > { %p1947_p1 = scmp.lt.s32.totalorder %s1945_s23, %s1939_s15 }
 0x4c3   : > { %p1948_p2 = por %p1947_p1, %p1946_p0 }
 0x4c5   : > { %v1434_v42 = vpop.f32.mrb[32].mxu0  ;;  %p1949_p3 = pnand %p1948_p2, %p1942_p13 }
 0x4c6   : > { %1443 = vrot.lane.b32.xlu1 %v1434_v42, %s2034_s25  ;;  %v1788_v44 = vpop.f32.mrb[33].mxu0 }
 0x4c7   : > { %v1437_v45 = vpop.f32.mrb[34].mxu0 }
 0x4c8   : > { %1445 = vrot.lane.b32.xlu0 %v1437_v45, %s2034_s25  ;;  %v1789_v38 = vpop.f32.mrb[35].mxu0 }
 0x4db   : > { %v592_v47 = vpop.permute.xlu0 %591 }
 0x4dc   : > { %598 = vst.msk [vmem:[#allocation3] sm:$0xff] %vm597_vm7, %v592_v47 }
 0x4df   : > { %v594_v48 = vpop.permute.xlu0 %593 }
 0x4e0   : > { %599 = vst.msk [vmem:[#allocation3 + $0x8] sm:$0xff] %vm597_vm7, %v594_v48 }
 0x510   : > { %v734_v0 = vpop.permute.xlu1 %733 }
 0x511   : > { %740 = vst.msk [vmem:[#allocation3] sm:$0xff] %vm739_vm8, %v734_v0 }
 0x512   : > { %v736_v1 = vpop.permute.xlu0 %735 }
 0x513   : > { %741 = vst.msk [vmem:[#allocation3 + $0x8] sm:$0xff] %vm739_vm8, %v736_v1 }
 0x518   : > { %v876_v8 = vpop.permute.xlu1 %875 }
 0x519   : > { %882 = vst.msk [vmem:[#allocation3] sm:$0xff] %vm881_vm9, %v876_v8 }
 0x51a   : > { %v878_v9 = vpop.permute.xlu0 %877 }
 0x51b   : > { %883 = vst.msk [vmem:[#allocation3 + $0x8] sm:$0xff] %vm881_vm9, %v878_v9 }
 0x520   : > { %v1018_v49 = vpop.permute.xlu1 %1017 }
 0x521   : > { %1024 = vst.msk [vmem:[#allocation3] sm:$0xff] %vm1023_vm10, %v1018_v49 }
 0x522   : > { %v1020_v50 = vpop.permute.xlu0 %1019 }
 0x523   : > { %1025 = vst.msk [vmem:[#allocation3 + $0x8] sm:$0xff] %vm1023_vm10, %v1020_v50 }
 0x528   : > { %v1160_v63 = vpop.permute.xlu1 %1159 }
 0x529   : > { %1166 = vst.msk [vmem:[#allocation3] sm:$0xff] %vm1165_vm11, %v1160_v63 }
 0x52a   : > { %v1162_v24 = vpop.permute.xlu0 %1161 }
 0x52b   : > { %1167 = vst.msk [vmem:[#allocation3 + $0x8] sm:$0xff] %vm1165_vm11, %v1162_v24 }
 0x530   : > { %v1302_v52 = vpop.permute.xlu1 %1301 }
 0x531   : > { %1308 = vst.msk [vmem:[#allocation3] sm:$0xff] %vm1307_vm12, %v1302_v52 }
 0x532   : > { %v1304_v53 = vpop.permute.xlu0 %1303 }
 0x533   : > { %1309 = vst.msk [vmem:[#allocation3 + $0x8] sm:$0xff] %vm1307_vm12, %v1304_v53 }
 0x538   : > { %v1444_v35 = vpop.permute.xlu1 %1443 }
 0x539   : > { %1450 = vst.msk [vmem:[#allocation3] sm:$0xff] %vm1449_vm13, %v1444_v35 }
 0x53a   : > { %v1446_v61 = vpop.permute.xlu0 %1445 }
 0x53b   : > { %1451 = vst.msk [vmem:[#allocation3 + $0x8] sm:$0xff] %vm1449_vm13, %v1446_v61 }
 0x540   : > { %v1452_v46 = vld [vmem:[#allocation3] sm:$0xff] }
 0x542   : > { %v1453_v30 = vld [vmem:[#allocation3 + $0x8] sm:$0xff] }
 0x543   : > { %v1454_v12 = vpack.c.bf16 %v1453_v30, %v1452_v46 }
 0x545   : > { %1795 = vmatmul.mubr.msk.bf16.vlgmr.msra.gmra.mrb[32].mxu1 %vm261_vm1, %v1454_v12 }
 0x618   : > { %v1515_v55 = vpop.f32.mrb[32].mxu1 }
 0x619   : > { %v1516_v34 = vadd.f32 %v1637_v25, %v1515_v55  ;;  %v1796_v56 = vpop.f32.mrb[33].mxu1 }
 0x61a   : > { %v1518_v13 = vpop.f32.mrb[34].mxu1 }
 0x61b   : > { %1522 = vst.msk [vmem:[%s228_s7] sm:$0xff] %vm261_vm1, %v1516_v34  ;;  %v1519_v7 = vadd.f32 %v1637_v25, %v1518_v13  ;;  %v1797_v11 = vpop.f32.mrb[35].mxu1 }
 0x61d   : > { %1523 = vst.msk [vmem:[%s228_s7 + $0x8] sm:$0xff] %vm261_vm1, %v1519_v7 }
 0x61e   : > { %1952 = shalt.err (!%p1949_p3)
}
 0x61f   : > { %s1953_s25 = scalar_lea.hbm %s2448_s14, 256  ;;  %s1957_s30 = scalar_lea.hbm %s2498_s5, 512 }
 0x620   : > { %p1954_p4 = scmp.ne.s32.totalorder %s2448_s14, %s1953_s25  ;;  %p1958_p9 = scmp.lt.u32.totalorder %s2448_s14, %s2498_s5 }
 0x621   : > { %p1959_p10 = scmp.lt.u32.totalorder %s1957_s30, %s1953_s25  ;;  %p1961_p12 = scmp.lt.u32.totalorder %s1953_s25, %s2448_s14 }
 0x622   : > { %p1955_p7 = pnand %p1954_p4, %p2105_p5 }
 0x623   : > { %p1960_p11 = por %p1959_p10, %p1958_p9 }
 0x624   : > { %p1956_p8 = pneg %p1955_p7 }
 0x625   : > { %p1962_p13 = por %p1961_p12, %p1960_p11 }
 0x627   : > { %p1963_p0 = pnand %p1962_p13, %p1956_p8 }
 0x629   : > { %1966 = shalt.err (!%p1963_p0)
}
 0x62a   : > { %s2036_s11 = smov 128  }
 0x62b   : > { %1798 = dma.vmem_to_hbm [thread:$0]  (%p2105_p5), %s2442_s8, 256, %s2448_s14, %s2451_s22, %s2036_s11, %s2036_s11, %s2029_s10  }
 0x62c PF: > { %p1804_p1 = scmp.ge.s32.totalorder %s2001_s21, 2  ;;  %s1553_s12 = sand.u32 1, %s1989_s18  }
 0x62d   : > { %s1554_s13 = scalar_lea.sflag [#allocation5], %s1553_s12 }
 0x62e   : > { %p1801_p2 = pnand %p1804_p1, %p2109_p6 }
 0x630   : > { %1984 = dma.done.wait (!%p1801_p2), %s1554_s13, 256  }
 0x631   : > { %1986 = vsyncadd (!%p1801_p2), %s1554_s13, 4294967040  ;;  %p15_p3 = scmp.ge.s32.totalorder %s2092_s24, 4   ;;  %s2501_s18 = smov %s1993_s19 }
 0x632   : > { %s2502_s19 = smov %s1997_s20  ;;  %s2503_s20 = smov %s2103_s27 }
 0x633   : > { %s2504_s21 = smov %s2092_s24  ;;  %17 = sbr.rel (!%p15_p3) target bundleno = 3 (0x3), region = 78 }
 0x63a   :  { %1559 = vsyncpa [#allocation5], 1 }
 0x63b   :  { %1561 = vsyncpa [#allocation5 + $0x1], 1 }

</bundles_post_ra>
